<compile_context>
chip_gen: v7x
topology: tpu7x:2x2x1
jax: 0.10.0
libtpu: 0.0.40
codegen_flags: <defaults>
</compile_context>

<pallas_src>
import functools

import numpy as np
import jax
import jax.numpy as jnp
from jax import lax
from jax.experimental import pallas as pl
from jax.experimental.pallas import tpu as pltpu

# synthetic "Options"
BATCH = 32       # options.batch_size (test value)
EMBED = 128      # options.embedding_size
HIDDEN = 32      # options.hidden_size
VIEW = 1         # self.view_size
EPS = 1e-5       # BatchNorm eps
LANES = 128      # lane-dense output width
# head lane segments inside the fused (HIDDEN, 128) head-weight slab
HEAD_SEGS = ((0, 50), (50, 100), (100, 104), (104, 108))   # lin2, lin3, lin4, lin5


def _sender_kernel(x_ref,                      # (tb, E)                VMEM
                   scale_ref, bias_ref,        # (H,) fused conv1+bn1   SMEM
                   c2w_ref,                    # (H,) conv2*bn2-scale   SMEM
                   shift2_ref,                 # (1,) bn2 shift         SMEM
                   l1t_ref,                    # (E, 128) lin1 (padded) VMEM
                   w12_ref,                    # (E, 128) lin1@heads    VMEM
                   segmat_ref,                 # (128,128) seg-sum mat  VMEM
                   h_ref, logp_ref,            # (tb, 128) outputs      VMEM
                   *, nacc):
    x = x_ref[...]                                            # (tb, E) f32

    # conv1 + bn1 + tanh + conv2 (+ bn2 scale).  `nacc` independent partial
    # accumulators break the HIDDEN-long VALU add chain; the group loop is
    # fully unrolled so independent tanhs stream through the EUP.
    ngroups = HIDDEN // nacc

    def body(g, accs):
        c0 = g * nacc
        return tuple(
            a + c2w_ref[c0 + j] * jnp.tanh(x * scale_ref[c0 + j] + bias_ref[c0 + j])
            for j, a in enumerate(accs))

    accs = lax.fori_loop(0, ngroups, body,
                         tuple(jnp.zeros_like(x) for _ in range(nacc)),
                         unroll=True)
    s = accs[0]
    for a in accs[1:]:
        s = s + a

    # bn2 shift + tanh (bn2 scale already folded into c2w)
    u = jnp.tanh(s + shift2_ref[0])                           # (tb, E) f32
    u_m = u.astype(l1t_ref.dtype)                             # MXU operand dtype

    # Two INDEPENDENT lane-dense MXU matmuls (no h->z serial dependency):
    #   h = u @ lin1 (padded to 128 lanes), z = u @ (lin1 @ fused-heads).
    h_full = jnp.dot(u_m, l1t_ref[...], preferred_element_type=jnp.float32)
    z = jnp.dot(u_m, w12_ref[...], preferred_element_type=jnp.float32)
    h_ref[...] = h_full                                       # (tb, 128)

    # Segmented log_softmax over lane segments of the (tb, 128) slab.
    col = lax.broadcasted_iota(jnp.int32, z.shape, 1)
    seg_max = jnp.zeros_like(z)
    for lo, hi in HEAD_SEGS:
        m = (col >= lo) & (col < hi)
        mx = jnp.max(jnp.where(m, z, -jnp.inf), axis=-1, keepdims=True)
        seg_max = jnp.where(m, mx, seg_max)
    e = jnp.exp(z - seg_max)                                  # pad lanes: exp(0)=1
    # Per-lane segment sums via one MXU matmul against the block-ones matrix;
    # identity on pad lanes keeps their sum exactly 1 -> logp pad lanes = 0.
    seg_sum = jnp.dot(e.astype(segmat_ref.dtype), segmat_ref[...],
                      preferred_element_type=jnp.float32)
    logp_ref[...] = z - seg_max - jnp.log(seg_sum)


def _pick_tb(bp):
    """Batch tile: multiple of 8 dividing bp, capped at 128 (vreg pressure in
    the unrolled tanh loop); prefer >=2 grid steps so v7x's 2nd TC is used."""
    if bp <= 8:
        return bp
    if bp % 16 == 0 and bp <= 256:
        return min(bp // 2, 128)
    if bp <= 128:
        return bp
    tb = 128
    while bp % tb:
        tb -= 8
    return tb


def base_sender_forward(x, params, *, tb=None, mxu_dtype=jnp.bfloat16):
    (c1w, g1, b1, m1, v1, c2w, bn2, l1t, l2t, l3t, l4t, l5t) = params
    B = x.shape[0]

    # Pad ragged batches to a multiple of 8 (pad rows are sliced off below).
    Bp = ((B + 7) // 8) * 8
    if Bp != B:
        x = jnp.concatenate([x, jnp.zeros((Bp - B, x.shape[1]), x.dtype)], axis=0)

    if tb is None:
        tb = _pick_tb(Bp)
    assert Bp % tb == 0 and tb % 8 == 0 and tb <= 128, (B, Bp, tb)

    # Partial-accumulator count: enough to break the add chain at small tiles,
    # but capped so the fully unrolled loop stays within the 64-vreg file.
    nacc = 4 if tb <= 32 else (2 if tb <= 64 else 1)
    assert HIDDEN % nacc == 0

    # Fuse conv1 + bn1 (eval) into per-channel affine; fold bn2 scale into conv2.
    inv1 = g1 * lax.rsqrt(v1 + EPS)
    scale = (c1w * inv1).astype(jnp.float32)                  # (H,)
    bias = (b1 - m1 * inv1).astype(jnp.float32)               # (H,)
    g2, b2, m2, v2 = bn2[0], bn2[1], bn2[2], bn2[3]
    scale2 = g2 * lax.rsqrt(v2 + EPS)
    c2w_eff = (c2w * scale2).astype(jnp.float32)              # (H,)
    shift2 = jnp.reshape(b2 - m2 * scale2, (1,)).astype(jnp.float32)

    # Lane-dense padded weights (MXU operand dtype, zero padding stays exact).
    l1t_pad = jnp.zeros((EMBED, LANES), jnp.float32).at[:, :HIDDEN].set(l1t)
    whead = jnp.zeros((HIDDEN, LANES), jnp.float32)
    for (lo, hi), w in zip(HEAD_SEGS, (l2t, l3t, l4t, l5t)):
        whead = whead.at[:, lo:hi].set(w)
    w12 = jnp.dot(l1t, whead)                                 # (E, 128), f32
    l1t_pad = l1t_pad.astype(mxu_dtype)
    w12 = w12.astype(mxu_dtype)

    # Segment-sum matrix: all-ones block per head segment, identity on pads.
    segmat_np = np.zeros((LANES, LANES), np.float32)
    for lo, hi in HEAD_SEGS:
        segmat_np[lo:hi, lo:hi] = 1.0
    for p in range(HEAD_SEGS[-1][1], LANES):
        segmat_np[p, p] = 1.0
    segmat = jnp.asarray(segmat_np, dtype=mxu_dtype)

    smem = pl.BlockSpec(memory_space=pltpu.MemorySpace.SMEM)
    grid = (Bp // tb,)
    kernel = functools.partial(_sender_kernel, nacc=nacc)

    h_slab, logp = pl.pallas_call(
        kernel,
        out_shape=(jax.ShapeDtypeStruct((Bp, LANES), jnp.float32),   # h (padded)
                   jax.ShapeDtypeStruct((Bp, LANES), jnp.float32)),  # fused log-probs
        grid=grid,
        in_specs=[pl.BlockSpec((tb, EMBED), lambda i: (i, 0)),
                  smem, smem, smem, smem,
                  pl.BlockSpec((EMBED, LANES), lambda i: (0, 0)),
                  pl.BlockSpec((EMBED, LANES), lambda i: (0, 0)),
                  pl.BlockSpec((LANES, LANES), lambda i: (0, 0))],
        out_specs=(pl.BlockSpec((tb, LANES), lambda i: (i, 0)),
                   pl.BlockSpec((tb, LANES), lambda i: (i, 0))),
        compiler_params=pltpu.CompilerParams(
            dimension_semantics=("parallel",)),
    )(x, scale, bias, c2w_eff, shift2, l1t_pad, w12, segmat)

    h = h_slab[:B, :HIDDEN]
    s1 = logp[:B, HEAD_SEGS[0][0]:HEAD_SEGS[0][1]]
    s2 = logp[:B, HEAD_SEGS[1][0]:HEAD_SEGS[1][1]]
    p1 = logp[:B, HEAD_SEGS[2][0]:HEAD_SEGS[2][1]]
    p2 = logp[:B, HEAD_SEGS[3][0]:HEAD_SEGS[3][1]]
    return h, s1, s2, p1, p2


def reference(x, params):
    """Pure-JAX reference mirroring the PyTorch forward (eval-mode BN)."""
    (c1w, g1, b1, m1, v1, c2w, bn2, l1t, l2t, l3t, l4t, l5t) = params
    t = x[:, None, :] * c1w[None, :, None]                            # conv1
    t = ((t - m1[None, :, None]) / jnp.sqrt(v1 + EPS)[None, :, None]
         * g1[None, :, None] + b1[None, :, None])                     # bn1
    t = jnp.tanh(t)
    s = jnp.sum(t * c2w[None, :, None], axis=1)                       # conv2
    g2, be2, me2, va2 = bn2
    u = jnp.tanh((s - me2) / jnp.sqrt(va2 + EPS) * g2 + be2)          # bn2+tanh
    h = u @ l1t                                                       # lin1
    ls = jax.nn.log_softmax
    return (h, ls(h @ l2t, axis=1), ls(h @ l3t, axis=1),
            ls(h @ l4t, axis=1), ls(h @ l5t, axis=1))


def init_params(key):
    ks = jax.random.split(key, 12)
    c1w = 0.2 * jax.random.normal(ks[0], (HIDDEN,), jnp.float32)   # conv1 (H,1,1,1)
    g1 = jax.random.uniform(ks[1], (HIDDEN,), jnp.float32, 0.8, 1.2)
    b1 = 0.1 * jax.random.normal(ks[2], (HIDDEN,), jnp.float32)
    m1 = 0.1 * jax.random.normal(ks[3], (HIDDEN,), jnp.float32)
    v1 = jax.random.uniform(ks[4], (HIDDEN,), jnp.float32, 0.5, 1.5)
    c2w = 0.2 * jax.random.normal(ks[5], (HIDDEN,), jnp.float32)   # conv2 (1,1,H,1)
    bn2 = jnp.array([1.05, 0.02, -0.03, 0.9], jnp.float32)         # g2,b2,mean2,var2
    # Linear weights, stored pre-transposed (PyTorch Linear is y = x @ W.T)
    l1t = 0.1 * jax.random.normal(ks[6], (EMBED, HIDDEN), jnp.float32)
    l2t = 0.1 * jax.random.normal(ks[7], (HIDDEN, 50), jnp.float32)
    l3t = 0.1 * jax.random.normal(ks[8], (HIDDEN, 50), jnp.float32)
    l4t = 0.1 * jax.random.normal(ks[9], (HIDDEN, 4), jnp.float32)
    l5t = 0.1 * jax.random.normal(ks[10], (HIDDEN, 4), jnp.float32)
    return (c1w, g1, b1, m1, v1, c2w, bn2, l1t, l2t, l3t, l4t, l5t)


def _check(outs, refs, rtol, atol, tag):
    names = ["h", "shape1_pred", "shape2_pred", "pos1_pred", "pos2_pred"]
    for name, o, r in zip(names, outs, refs):
        assert o.shape == r.shape, (tag, name, o.shape, r.shape)
        assert jnp.allclose(o, r, rtol=rtol, atol=atol), (tag, name)


if __name__ == "__main__":
    key = jax.random.PRNGKey(0)
    kx, kp = jax.random.split(key)
    params = init_params(kp)

    # embedder output, already flattened: (batch_size, view_size * embedding_size)
    x = jax.random.normal(kx, (BATCH, VIEW * EMBED), jnp.float32)
    refs = jax.block_until_ready(reference(x, params))

    # 1) f32 MXU operands: validates the math tightly (auto tb=16, grid=(2,)).
    outs = jax.block_until_ready(
        base_sender_forward(x, params, mxu_dtype=jnp.float32))
    _check(outs, refs, 1e-4, 1e-4, "f32")

    # 2) default bf16 MXU operands (perf path): looser tolerance for bf16
    #    rounding of the MXU inputs (accumulation stays f32).
    outs_bf16 = jax.block_until_ready(base_sender_forward(x, params))
    _check(outs_bf16, refs, 5e-2, 5e-2, "bf16")

    # 3) ragged batch (B=20 -> padded to 24, single grid step) to exercise the
    #    batch-padding path.
    xr = jax.random.normal(jax.random.PRNGKey(1), (20, VIEW * EMBED), jnp.float32)
    outs_r = jax.block_until_ready(base_sender_forward(xr, params))
    _check(outs_r, jax.block_until_ready(reference(xr, params)), 5e-2, 5e-2, "ragged")

    print("KERNEL_OK")
</pallas_src>

<mosaic_0001>
module attributes {stable_mosaic.version = 11 : i64} {
  func.func @_sender_kernel(%arg0: i32, %arg1: memref<16x128xf32, #tpu.memory_space<vmem>>, %arg2: memref<32xf32, #tpu.memory_space<smem>>, %arg3: memref<32xf32, #tpu.memory_space<smem>>, %arg4: memref<32xf32, #tpu.memory_space<smem>>, %arg5: memref<1xf32, #tpu.memory_space<smem>>, %arg6: memref<128x128xf32, #tpu.memory_space<vmem>>, %arg7: memref<128x128xf32, #tpu.memory_space<vmem>>, %arg8: memref<128x128xf32, #tpu.memory_space<vmem>>, %arg9: memref<16x128xf32, #tpu.memory_space<vmem>>, %arg10: memref<16x128xf32, #tpu.memory_space<vmem>>) attributes {dimension_semantics = [#tpu.dimension_semantics<parallel>], iteration_bounds = array<i64: 2>, scalar_prefetch = 0 : i64, scratch_operands = 0 : i64, tpu.core_type = #tpu.core_type<tc>, window_params = [{transform_indices = @transform_0, window_bounds = array<i64: 16, 128>}, {transform_indices = @transform_1, window_bounds = array<i64: 32>}, {transform_indices = @transform_2, window_bounds = array<i64: 32>}, {transform_indices = @transform_3, window_bounds = array<i64: 32>}, {transform_indices = @transform_4, window_bounds = array<i64: 1>}, {pipeline_mode = #tpu.pipeline_mode<synchronous>, transform_indices = @transform_5, window_bounds = array<i64: 128, 128>}, {pipeline_mode = #tpu.pipeline_mode<synchronous>, transform_indices = @transform_6, window_bounds = array<i64: 128, 128>}, {pipeline_mode = #tpu.pipeline_mode<synchronous>, transform_indices = @transform_7, window_bounds = array<i64: 128, 128>}, {transform_indices = @transform_8, window_bounds = array<i64: 16, 128>}, {transform_indices = @transform_9, window_bounds = array<i64: 16, 128>}]} {
    %c0 = arith.constant 0 : index
    %c0_0 = arith.constant 0 : index
    %0 = vector.load %arg1[%c0, %c0_0] : memref<16x128xf32, #tpu.memory_space<vmem>>, vector<16x128xf32>
    %cst = arith.constant 0.000000e+00 : f32
    %1 = vector.broadcast %cst : f32 to vector<16x128xf32>
    %cst_1 = arith.constant 0.000000e+00 : f32
    %2 = vector.broadcast %cst_1 : f32 to vector<16x128xf32>
    %cst_2 = arith.constant 0.000000e+00 : f32
    %3 = vector.broadcast %cst_2 : f32 to vector<16x128xf32>
    %cst_3 = arith.constant 0.000000e+00 : f32
    %4 = vector.broadcast %cst_3 : f32 to vector<16x128xf32>
    %c0_i32 = arith.constant 0 : i32
    %c4_i32 = arith.constant 4 : i32
    %5 = arith.muli %c0_i32, %c4_i32 : i32
    %c0_i32_4 = arith.constant 0 : i32
    %6 = arith.addi %5, %c0_i32_4 : i32
    %7 = arith.index_cast %6 : i32 to index
    %8 = memref.load %arg4[%7] : memref<32xf32, #tpu.memory_space<smem>>
    %c0_i32_5 = arith.constant 0 : i32
    %9 = arith.addi %5, %c0_i32_5 : i32
    %10 = arith.index_cast %9 : i32 to index
    %11 = memref.load %arg2[%10] : memref<32xf32, #tpu.memory_space<smem>>
    %12 = vector.broadcast %11 : f32 to vector<16x128xf32>
    %13 = arith.mulf %0, %12 : vector<16x128xf32>
    %c0_i32_6 = arith.constant 0 : i32
    %14 = arith.addi %5, %c0_i32_6 : i32
    %15 = arith.index_cast %14 : i32 to index
    %16 = memref.load %arg3[%15] : memref<32xf32, #tpu.memory_space<smem>>
    %17 = vector.broadcast %16 : f32 to vector<16x128xf32>
    %18 = arith.addf %13, %17 : vector<16x128xf32>
    %19 = math.tanh %18 : vector<16x128xf32>
    %20 = vector.broadcast %8 : f32 to vector<16x128xf32>
    %21 = arith.mulf %20, %19 : vector<16x128xf32>
    %22 = arith.addf %1, %21 : vector<16x128xf32>
    %c1_i32 = arith.constant 1 : i32
    %23 = arith.addi %5, %c1_i32 : i32
    %24 = arith.index_cast %23 : i32 to index
    %25 = memref.load %arg4[%24] : memref<32xf32, #tpu.memory_space<smem>>
    %c1_i32_7 = arith.constant 1 : i32
    %26 = arith.addi %5, %c1_i32_7 : i32
    %27 = arith.index_cast %26 : i32 to index
    %28 = memref.load %arg2[%27] : memref<32xf32, #tpu.memory_space<smem>>
    %29 = vector.broadcast %28 : f32 to vector<16x128xf32>
    %30 = arith.mulf %0, %29 : vector<16x128xf32>
    %c1_i32_8 = arith.constant 1 : i32
    %31 = arith.addi %5, %c1_i32_8 : i32
    %32 = arith.index_cast %31 : i32 to index
    %33 = memref.load %arg3[%32] : memref<32xf32, #tpu.memory_space<smem>>
    %34 = vector.broadcast %33 : f32 to vector<16x128xf32>
    %35 = arith.addf %30, %34 : vector<16x128xf32>
    %36 = math.tanh %35 : vector<16x128xf32>
    %37 = vector.broadcast %25 : f32 to vector<16x128xf32>
    %38 = arith.mulf %37, %36 : vector<16x128xf32>
    %39 = arith.addf %2, %38 : vector<16x128xf32>
    %c2_i32 = arith.constant 2 : i32
    %40 = arith.addi %5, %c2_i32 : i32
    %41 = arith.index_cast %40 : i32 to index
    %42 = memref.load %arg4[%41] : memref<32xf32, #tpu.memory_space<smem>>
    %c2_i32_9 = arith.constant 2 : i32
    %43 = arith.addi %5, %c2_i32_9 : i32
    %44 = arith.index_cast %43 : i32 to index
    %45 = memref.load %arg2[%44] : memref<32xf32, #tpu.memory_space<smem>>
    %46 = vector.broadcast %45 : f32 to vector<16x128xf32>
    %47 = arith.mulf %0, %46 : vector<16x128xf32>
    %c2_i32_10 = arith.constant 2 : i32
    %48 = arith.addi %5, %c2_i32_10 : i32
    %49 = arith.index_cast %48 : i32 to index
    %50 = memref.load %arg3[%49] : memref<32xf32, #tpu.memory_space<smem>>
    %51 = vector.broadcast %50 : f32 to vector<16x128xf32>
    %52 = arith.addf %47, %51 : vector<16x128xf32>
    %53 = math.tanh %52 : vector<16x128xf32>
    %54 = vector.broadcast %42 : f32 to vector<16x128xf32>
    %55 = arith.mulf %54, %53 : vector<16x128xf32>
    %56 = arith.addf %3, %55 : vector<16x128xf32>
    %c3_i32 = arith.constant 3 : i32
    %57 = arith.addi %5, %c3_i32 : i32
    %58 = arith.index_cast %57 : i32 to index
    %59 = memref.load %arg4[%58] : memref<32xf32, #tpu.memory_space<smem>>
    %c3_i32_11 = arith.constant 3 : i32
    %60 = arith.addi %5, %c3_i32_11 : i32
    %61 = arith.index_cast %60 : i32 to index
    %62 = memref.load %arg2[%61] : memref<32xf32, #tpu.memory_space<smem>>
    %63 = vector.broadcast %62 : f32 to vector<16x128xf32>
    %64 = arith.mulf %0, %63 : vector<16x128xf32>
    %c3_i32_12 = arith.constant 3 : i32
    %65 = arith.addi %5, %c3_i32_12 : i32
    %66 = arith.index_cast %65 : i32 to index
    %67 = memref.load %arg3[%66] : memref<32xf32, #tpu.memory_space<smem>>
    %68 = vector.broadcast %67 : f32 to vector<16x128xf32>
    %69 = arith.addf %64, %68 : vector<16x128xf32>
    %70 = math.tanh %69 : vector<16x128xf32>
    %71 = vector.broadcast %59 : f32 to vector<16x128xf32>
    %72 = arith.mulf %71, %70 : vector<16x128xf32>
    %73 = arith.addf %4, %72 : vector<16x128xf32>
    %c1_i32_13 = arith.constant 1 : i32
    %c4_i32_14 = arith.constant 4 : i32
    %74 = arith.muli %c1_i32_13, %c4_i32_14 : i32
    %c0_i32_15 = arith.constant 0 : i32
    %75 = arith.addi %74, %c0_i32_15 : i32
    %76 = arith.index_cast %75 : i32 to index
    %77 = memref.load %arg4[%76] : memref<32xf32, #tpu.memory_space<smem>>
    %c0_i32_16 = arith.constant 0 : i32
    %78 = arith.addi %74, %c0_i32_16 : i32
    %79 = arith.index_cast %78 : i32 to index
    %80 = memref.load %arg2[%79] : memref<32xf32, #tpu.memory_space<smem>>
    %81 = vector.broadcast %80 : f32 to vector<16x128xf32>
    %82 = arith.mulf %0, %81 : vector<16x128xf32>
    %c0_i32_17 = arith.constant 0 : i32
    %83 = arith.addi %74, %c0_i32_17 : i32
    %84 = arith.index_cast %83 : i32 to index
    %85 = memref.load %arg3[%84] : memref<32xf32, #tpu.memory_space<smem>>
    %86 = vector.broadcast %85 : f32 to vector<16x128xf32>
    %87 = arith.addf %82, %86 : vector<16x128xf32>
    %88 = math.tanh %87 : vector<16x128xf32>
    %89 = vector.broadcast %77 : f32 to vector<16x128xf32>
    %90 = arith.mulf %89, %88 : vector<16x128xf32>
    %91 = arith.addf %22, %90 : vector<16x128xf32>
    %c1_i32_18 = arith.constant 1 : i32
    %92 = arith.addi %74, %c1_i32_18 : i32
    %93 = arith.index_cast %92 : i32 to index
    %94 = memref.load %arg4[%93] : memref<32xf32, #tpu.memory_space<smem>>
    %c1_i32_19 = arith.constant 1 : i32
    %95 = arith.addi %74, %c1_i32_19 : i32
    %96 = arith.index_cast %95 : i32 to index
    %97 = memref.load %arg2[%96] : memref<32xf32, #tpu.memory_space<smem>>
    %98 = vector.broadcast %97 : f32 to vector<16x128xf32>
    %99 = arith.mulf %0, %98 : vector<16x128xf32>
    %c1_i32_20 = arith.constant 1 : i32
    %100 = arith.addi %74, %c1_i32_20 : i32
    %101 = arith.index_cast %100 : i32 to index
    %102 = memref.load %arg3[%101] : memref<32xf32, #tpu.memory_space<smem>>
    %103 = vector.broadcast %102 : f32 to vector<16x128xf32>
    %104 = arith.addf %99, %103 : vector<16x128xf32>
    %105 = math.tanh %104 : vector<16x128xf32>
    %106 = vector.broadcast %94 : f32 to vector<16x128xf32>
    %107 = arith.mulf %106, %105 : vector<16x128xf32>
    %108 = arith.addf %39, %107 : vector<16x128xf32>
    %c2_i32_21 = arith.constant 2 : i32
    %109 = arith.addi %74, %c2_i32_21 : i32
    %110 = arith.index_cast %109 : i32 to index
    %111 = memref.load %arg4[%110] : memref<32xf32, #tpu.memory_space<smem>>
    %c2_i32_22 = arith.constant 2 : i32
    %112 = arith.addi %74, %c2_i32_22 : i32
    %113 = arith.index_cast %112 : i32 to index
    %114 = memref.load %arg2[%113] : memref<32xf32, #tpu.memory_space<smem>>
    %115 = vector.broadcast %114 : f32 to vector<16x128xf32>
    %116 = arith.mulf %0, %115 : vector<16x128xf32>
    %c2_i32_23 = arith.constant 2 : i32
    %117 = arith.addi %74, %c2_i32_23 : i32
    %118 = arith.index_cast %117 : i32 to index
    %119 = memref.load %arg3[%118] : memref<32xf32, #tpu.memory_space<smem>>
    %120 = vector.broadcast %119 : f32 to vector<16x128xf32>
    %121 = arith.addf %116, %120 : vector<16x128xf32>
    %122 = math.tanh %121 : vector<16x128xf32>
    %123 = vector.broadcast %111 : f32 to vector<16x128xf32>
    %124 = arith.mulf %123, %122 : vector<16x128xf32>
    %125 = arith.addf %56, %124 : vector<16x128xf32>
    %c3_i32_24 = arith.constant 3 : i32
    %126 = arith.addi %74, %c3_i32_24 : i32
    %127 = arith.index_cast %126 : i32 to index
    %128 = memref.load %arg4[%127] : memref<32xf32, #tpu.memory_space<smem>>
    %c3_i32_25 = arith.constant 3 : i32
    %129 = arith.addi %74, %c3_i32_25 : i32
    %130 = arith.index_cast %129 : i32 to index
    %131 = memref.load %arg2[%130] : memref<32xf32, #tpu.memory_space<smem>>
    %132 = vector.broadcast %131 : f32 to vector<16x128xf32>
    %133 = arith.mulf %0, %132 : vector<16x128xf32>
    %c3_i32_26 = arith.constant 3 : i32
    %134 = arith.addi %74, %c3_i32_26 : i32
    %135 = arith.index_cast %134 : i32 to index
    %136 = memref.load %arg3[%135] : memref<32xf32, #tpu.memory_space<smem>>
    %137 = vector.broadcast %136 : f32 to vector<16x128xf32>
    %138 = arith.addf %133, %137 : vector<16x128xf32>
    %139 = math.tanh %138 : vector<16x128xf32>
    %140 = vector.broadcast %128 : f32 to vector<16x128xf32>
    %141 = arith.mulf %140, %139 : vector<16x128xf32>
    %142 = arith.addf %73, %141 : vector<16x128xf32>
    %c2_i32_27 = arith.constant 2 : i32
    %c4_i32_28 = arith.constant 4 : i32
    %143 = arith.muli %c2_i32_27, %c4_i32_28 : i32
    %c0_i32_29 = arith.constant 0 : i32
    %144 = arith.addi %143, %c0_i32_29 : i32
    %145 = arith.index_cast %144 : i32 to index
    %146 = memref.load %arg4[%145] : memref<32xf32, #tpu.memory_space<smem>>
    %c0_i32_30 = arith.constant 0 : i32
    %147 = arith.addi %143, %c0_i32_30 : i32
    %148 = arith.index_cast %147 : i32 to index
    %149 = memref.load %arg2[%148] : memref<32xf32, #tpu.memory_space<smem>>
    %150 = vector.broadcast %149 : f32 to vector<16x128xf32>
    %151 = arith.mulf %0, %150 : vector<16x128xf32>
    %c0_i32_31 = arith.constant 0 : i32
    %152 = arith.addi %143, %c0_i32_31 : i32
    %153 = arith.index_cast %152 : i32 to index
    %154 = memref.load %arg3[%153] : memref<32xf32, #tpu.memory_space<smem>>
    %155 = vector.broadcast %154 : f32 to vector<16x128xf32>
    %156 = arith.addf %151, %155 : vector<16x128xf32>
    %157 = math.tanh %156 : vector<16x128xf32>
    %158 = vector.broadcast %146 : f32 to vector<16x128xf32>
    %159 = arith.mulf %158, %157 : vector<16x128xf32>
    %160 = arith.addf %91, %159 : vector<16x128xf32>
    %c1_i32_32 = arith.constant 1 : i32
    %161 = arith.addi %143, %c1_i32_32 : i32
    %162 = arith.index_cast %161 : i32 to index
    %163 = memref.load %arg4[%162] : memref<32xf32, #tpu.memory_space<smem>>
    %c1_i32_33 = arith.constant 1 : i32
    %164 = arith.addi %143, %c1_i32_33 : i32
    %165 = arith.index_cast %164 : i32 to index
    %166 = memref.load %arg2[%165] : memref<32xf32, #tpu.memory_space<smem>>
    %167 = vector.broadcast %166 : f32 to vector<16x128xf32>
    %168 = arith.mulf %0, %167 : vector<16x128xf32>
    %c1_i32_34 = arith.constant 1 : i32
    %169 = arith.addi %143, %c1_i32_34 : i32
    %170 = arith.index_cast %169 : i32 to index
    %171 = memref.load %arg3[%170] : memref<32xf32, #tpu.memory_space<smem>>
    %172 = vector.broadcast %171 : f32 to vector<16x128xf32>
    %173 = arith.addf %168, %172 : vector<16x128xf32>
    %174 = math.tanh %173 : vector<16x128xf32>
    %175 = vector.broadcast %163 : f32 to vector<16x128xf32>
    %176 = arith.mulf %175, %174 : vector<16x128xf32>
    %177 = arith.addf %108, %176 : vector<16x128xf32>
    %c2_i32_35 = arith.constant 2 : i32
    %178 = arith.addi %143, %c2_i32_35 : i32
    %179 = arith.index_cast %178 : i32 to index
    %180 = memref.load %arg4[%179] : memref<32xf32, #tpu.memory_space<smem>>
    %c2_i32_36 = arith.constant 2 : i32
    %181 = arith.addi %143, %c2_i32_36 : i32
    %182 = arith.index_cast %181 : i32 to index
    %183 = memref.load %arg2[%182] : memref<32xf32, #tpu.memory_space<smem>>
    %184 = vector.broadcast %183 : f32 to vector<16x128xf32>
    %185 = arith.mulf %0, %184 : vector<16x128xf32>
    %c2_i32_37 = arith.constant 2 : i32
    %186 = arith.addi %143, %c2_i32_37 : i32
    %187 = arith.index_cast %186 : i32 to index
    %188 = memref.load %arg3[%187] : memref<32xf32, #tpu.memory_space<smem>>
    %189 = vector.broadcast %188 : f32 to vector<16x128xf32>
    %190 = arith.addf %185, %189 : vector<16x128xf32>
    %191 = math.tanh %190 : vector<16x128xf32>
    %192 = vector.broadcast %180 : f32 to vector<16x128xf32>
    %193 = arith.mulf %192, %191 : vector<16x128xf32>
    %194 = arith.addf %125, %193 : vector<16x128xf32>
    %c3_i32_38 = arith.constant 3 : i32
    %195 = arith.addi %143, %c3_i32_38 : i32
    %196 = arith.index_cast %195 : i32 to index
    %197 = memref.load %arg4[%196] : memref<32xf32, #tpu.memory_space<smem>>
    %c3_i32_39 = arith.constant 3 : i32
    %198 = arith.addi %143, %c3_i32_39 : i32
    %199 = arith.index_cast %198 : i32 to index
    %200 = memref.load %arg2[%199] : memref<32xf32, #tpu.memory_space<smem>>
    %201 = vector.broadcast %200 : f32 to vector<16x128xf32>
    %202 = arith.mulf %0, %201 : vector<16x128xf32>
    %c3_i32_40 = arith.constant 3 : i32
    %203 = arith.addi %143, %c3_i32_40 : i32
    %204 = arith.index_cast %203 : i32 to index
    %205 = memref.load %arg3[%204] : memref<32xf32, #tpu.memory_space<smem>>
    %206 = vector.broadcast %205 : f32 to vector<16x128xf32>
    %207 = arith.addf %202, %206 : vector<16x128xf32>
    %208 = math.tanh %207 : vector<16x128xf32>
    %209 = vector.broadcast %197 : f32 to vector<16x128xf32>
    %210 = arith.mulf %209, %208 : vector<16x128xf32>
    %211 = arith.addf %142, %210 : vector<16x128xf32>
    %c3_i32_41 = arith.constant 3 : i32
    %c4_i32_42 = arith.constant 4 : i32
    %212 = arith.muli %c3_i32_41, %c4_i32_42 : i32
    %c0_i32_43 = arith.constant 0 : i32
    %213 = arith.addi %212, %c0_i32_43 : i32
    %214 = arith.index_cast %213 : i32 to index
    %215 = memref.load %arg4[%214] : memref<32xf32, #tpu.memory_space<smem>>
    %c0_i32_44 = arith.constant 0 : i32
    %216 = arith.addi %212, %c0_i32_44 : i32
    %217 = arith.index_cast %216 : i32 to index
    %218 = memref.load %arg2[%217] : memref<32xf32, #tpu.memory_space<smem>>
    %219 = vector.broadcast %218 : f32 to vector<16x128xf32>
    %220 = arith.mulf %0, %219 : vector<16x128xf32>
    %c0_i32_45 = arith.constant 0 : i32
    %221 = arith.addi %212, %c0_i32_45 : i32
    %222 = arith.index_cast %221 : i32 to index
    %223 = memref.load %arg3[%222] : memref<32xf32, #tpu.memory_space<smem>>
    %224 = vector.broadcast %223 : f32 to vector<16x128xf32>
    %225 = arith.addf %220, %224 : vector<16x128xf32>
    %226 = math.tanh %225 : vector<16x128xf32>
    %227 = vector.broadcast %215 : f32 to vector<16x128xf32>
    %228 = arith.mulf %227, %226 : vector<16x128xf32>
    %229 = arith.addf %160, %228 : vector<16x128xf32>
    %c1_i32_46 = arith.constant 1 : i32
    %230 = arith.addi %212, %c1_i32_46 : i32
    %231 = arith.index_cast %230 : i32 to index
    %232 = memref.load %arg4[%231] : memref<32xf32, #tpu.memory_space<smem>>
    %c1_i32_47 = arith.constant 1 : i32
    %233 = arith.addi %212, %c1_i32_47 : i32
    %234 = arith.index_cast %233 : i32 to index
    %235 = memref.load %arg2[%234] : memref<32xf32, #tpu.memory_space<smem>>
    %236 = vector.broadcast %235 : f32 to vector<16x128xf32>
    %237 = arith.mulf %0, %236 : vector<16x128xf32>
    %c1_i32_48 = arith.constant 1 : i32
    %238 = arith.addi %212, %c1_i32_48 : i32
    %239 = arith.index_cast %238 : i32 to index
    %240 = memref.load %arg3[%239] : memref<32xf32, #tpu.memory_space<smem>>
    %241 = vector.broadcast %240 : f32 to vector<16x128xf32>
    %242 = arith.addf %237, %241 : vector<16x128xf32>
    %243 = math.tanh %242 : vector<16x128xf32>
    %244 = vector.broadcast %232 : f32 to vector<16x128xf32>
    %245 = arith.mulf %244, %243 : vector<16x128xf32>
    %246 = arith.addf %177, %245 : vector<16x128xf32>
    %c2_i32_49 = arith.constant 2 : i32
    %247 = arith.addi %212, %c2_i32_49 : i32
    %248 = arith.index_cast %247 : i32 to index
    %249 = memref.load %arg4[%248] : memref<32xf32, #tpu.memory_space<smem>>
    %c2_i32_50 = arith.constant 2 : i32
    %250 = arith.addi %212, %c2_i32_50 : i32
    %251 = arith.index_cast %250 : i32 to index
    %252 = memref.load %arg2[%251] : memref<32xf32, #tpu.memory_space<smem>>
    %253 = vector.broadcast %252 : f32 to vector<16x128xf32>
    %254 = arith.mulf %0, %253 : vector<16x128xf32>
    %c2_i32_51 = arith.constant 2 : i32
    %255 = arith.addi %212, %c2_i32_51 : i32
    %256 = arith.index_cast %255 : i32 to index
    %257 = memref.load %arg3[%256] : memref<32xf32, #tpu.memory_space<smem>>
    %258 = vector.broadcast %257 : f32 to vector<16x128xf32>
    %259 = arith.addf %254, %258 : vector<16x128xf32>
    %260 = math.tanh %259 : vector<16x128xf32>
    %261 = vector.broadcast %249 : f32 to vector<16x128xf32>
    %262 = arith.mulf %261, %260 : vector<16x128xf32>
    %263 = arith.addf %194, %262 : vector<16x128xf32>
    %c3_i32_52 = arith.constant 3 : i32
    %264 = arith.addi %212, %c3_i32_52 : i32
    %265 = arith.index_cast %264 : i32 to index
    %266 = memref.load %arg4[%265] : memref<32xf32, #tpu.memory_space<smem>>
    %c3_i32_53 = arith.constant 3 : i32
    %267 = arith.addi %212, %c3_i32_53 : i32
    %268 = arith.index_cast %267 : i32 to index
    %269 = memref.load %arg2[%268] : memref<32xf32, #tpu.memory_space<smem>>
    %270 = vector.broadcast %269 : f32 to vector<16x128xf32>
    %271 = arith.mulf %0, %270 : vector<16x128xf32>
    %c3_i32_54 = arith.constant 3 : i32
    %272 = arith.addi %212, %c3_i32_54 : i32
    %273 = arith.index_cast %272 : i32 to index
    %274 = memref.load %arg3[%273] : memref<32xf32, #tpu.memory_space<smem>>
    %275 = vector.broadcast %274 : f32 to vector<16x128xf32>
    %276 = arith.addf %271, %275 : vector<16x128xf32>
    %277 = math.tanh %276 : vector<16x128xf32>
    %278 = vector.broadcast %266 : f32 to vector<16x128xf32>
    %279 = arith.mulf %278, %277 : vector<16x128xf32>
    %280 = arith.addf %211, %279 : vector<16x128xf32>
    %c4_i32_55 = arith.constant 4 : i32
    %c4_i32_56 = arith.constant 4 : i32
    %281 = arith.muli %c4_i32_55, %c4_i32_56 : i32
    %c0_i32_57 = arith.constant 0 : i32
    %282 = arith.addi %281, %c0_i32_57 : i32
    %283 = arith.index_cast %282 : i32 to index
    %284 = memref.load %arg4[%283] : memref<32xf32, #tpu.memory_space<smem>>
    %c0_i32_58 = arith.constant 0 : i32
    %285 = arith.addi %281, %c0_i32_58 : i32
    %286 = arith.index_cast %285 : i32 to index
    %287 = memref.load %arg2[%286] : memref<32xf32, #tpu.memory_space<smem>>
    %288 = vector.broadcast %287 : f32 to vector<16x128xf32>
    %289 = arith.mulf %0, %288 : vector<16x128xf32>
    %c0_i32_59 = arith.constant 0 : i32
    %290 = arith.addi %281, %c0_i32_59 : i32
    %291 = arith.index_cast %290 : i32 to index
    %292 = memref.load %arg3[%291] : memref<32xf32, #tpu.memory_space<smem>>
    %293 = vector.broadcast %292 : f32 to vector<16x128xf32>
    %294 = arith.addf %289, %293 : vector<16x128xf32>
    %295 = math.tanh %294 : vector<16x128xf32>
    %296 = vector.broadcast %284 : f32 to vector<16x128xf32>
    %297 = arith.mulf %296, %295 : vector<16x128xf32>
    %298 = arith.addf %229, %297 : vector<16x128xf32>
    %c1_i32_60 = arith.constant 1 : i32
    %299 = arith.addi %281, %c1_i32_60 : i32
    %300 = arith.index_cast %299 : i32 to index
    %301 = memref.load %arg4[%300] : memref<32xf32, #tpu.memory_space<smem>>
    %c1_i32_61 = arith.constant 1 : i32
    %302 = arith.addi %281, %c1_i32_61 : i32
    %303 = arith.index_cast %302 : i32 to index
    %304 = memref.load %arg2[%303] : memref<32xf32, #tpu.memory_space<smem>>
    %305 = vector.broadcast %304 : f32 to vector<16x128xf32>
    %306 = arith.mulf %0, %305 : vector<16x128xf32>
    %c1_i32_62 = arith.constant 1 : i32
    %307 = arith.addi %281, %c1_i32_62 : i32
    %308 = arith.index_cast %307 : i32 to index
    %309 = memref.load %arg3[%308] : memref<32xf32, #tpu.memory_space<smem>>
    %310 = vector.broadcast %309 : f32 to vector<16x128xf32>
    %311 = arith.addf %306, %310 : vector<16x128xf32>
    %312 = math.tanh %311 : vector<16x128xf32>
    %313 = vector.broadcast %301 : f32 to vector<16x128xf32>
    %314 = arith.mulf %313, %312 : vector<16x128xf32>
    %315 = arith.addf %246, %314 : vector<16x128xf32>
    %c2_i32_63 = arith.constant 2 : i32
    %316 = arith.addi %281, %c2_i32_63 : i32
    %317 = arith.index_cast %316 : i32 to index
    %318 = memref.load %arg4[%317] : memref<32xf32, #tpu.memory_space<smem>>
    %c2_i32_64 = arith.constant 2 : i32
    %319 = arith.addi %281, %c2_i32_64 : i32
    %320 = arith.index_cast %319 : i32 to index
    %321 = memref.load %arg2[%320] : memref<32xf32, #tpu.memory_space<smem>>
    %322 = vector.broadcast %321 : f32 to vector<16x128xf32>
    %323 = arith.mulf %0, %322 : vector<16x128xf32>
    %c2_i32_65 = arith.constant 2 : i32
    %324 = arith.addi %281, %c2_i32_65 : i32
    %325 = arith.index_cast %324 : i32 to index
    %326 = memref.load %arg3[%325] : memref<32xf32, #tpu.memory_space<smem>>
    %327 = vector.broadcast %326 : f32 to vector<16x128xf32>
    %328 = arith.addf %323, %327 : vector<16x128xf32>
    %329 = math.tanh %328 : vector<16x128xf32>
    %330 = vector.broadcast %318 : f32 to vector<16x128xf32>
    %331 = arith.mulf %330, %329 : vector<16x128xf32>
    %332 = arith.addf %263, %331 : vector<16x128xf32>
    %c3_i32_66 = arith.constant 3 : i32
    %333 = arith.addi %281, %c3_i32_66 : i32
    %334 = arith.index_cast %333 : i32 to index
    %335 = memref.load %arg4[%334] : memref<32xf32, #tpu.memory_space<smem>>
    %c3_i32_67 = arith.constant 3 : i32
    %336 = arith.addi %281, %c3_i32_67 : i32
    %337 = arith.index_cast %336 : i32 to index
    %338 = memref.load %arg2[%337] : memref<32xf32, #tpu.memory_space<smem>>
    %339 = vector.broadcast %338 : f32 to vector<16x128xf32>
    %340 = arith.mulf %0, %339 : vector<16x128xf32>
    %c3_i32_68 = arith.constant 3 : i32
    %341 = arith.addi %281, %c3_i32_68 : i32
    %342 = arith.index_cast %341 : i32 to index
    %343 = memref.load %arg3[%342] : memref<32xf32, #tpu.memory_space<smem>>
    %344 = vector.broadcast %343 : f32 to vector<16x128xf32>
    %345 = arith.addf %340, %344 : vector<16x128xf32>
    %346 = math.tanh %345 : vector<16x128xf32>
    %347 = vector.broadcast %335 : f32 to vector<16x128xf32>
    %348 = arith.mulf %347, %346 : vector<16x128xf32>
    %349 = arith.addf %280, %348 : vector<16x128xf32>
    %c5_i32 = arith.constant 5 : i32
    %c4_i32_69 = arith.constant 4 : i32
    %350 = arith.muli %c5_i32, %c4_i32_69 : i32
    %c0_i32_70 = arith.constant 0 : i32
    %351 = arith.addi %350, %c0_i32_70 : i32
    %352 = arith.index_cast %351 : i32 to index
    %353 = memref.load %arg4[%352] : memref<32xf32, #tpu.memory_space<smem>>
    %c0_i32_71 = arith.constant 0 : i32
    %354 = arith.addi %350, %c0_i32_71 : i32
    %355 = arith.index_cast %354 : i32 to index
    %356 = memref.load %arg2[%355] : memref<32xf32, #tpu.memory_space<smem>>
    %357 = vector.broadcast %356 : f32 to vector<16x128xf32>
    %358 = arith.mulf %0, %357 : vector<16x128xf32>
    %c0_i32_72 = arith.constant 0 : i32
    %359 = arith.addi %350, %c0_i32_72 : i32
    %360 = arith.index_cast %359 : i32 to index
    %361 = memref.load %arg3[%360] : memref<32xf32, #tpu.memory_space<smem>>
    %362 = vector.broadcast %361 : f32 to vector<16x128xf32>
    %363 = arith.addf %358, %362 : vector<16x128xf32>
    %364 = math.tanh %363 : vector<16x128xf32>
    %365 = vector.broadcast %353 : f32 to vector<16x128xf32>
    %366 = arith.mulf %365, %364 : vector<16x128xf32>
    %367 = arith.addf %298, %366 : vector<16x128xf32>
    %c1_i32_73 = arith.constant 1 : i32
    %368 = arith.addi %350, %c1_i32_73 : i32
    %369 = arith.index_cast %368 : i32 to index
    %370 = memref.load %arg4[%369] : memref<32xf32, #tpu.memory_space<smem>>
    %c1_i32_74 = arith.constant 1 : i32
    %371 = arith.addi %350, %c1_i32_74 : i32
    %372 = arith.index_cast %371 : i32 to index
    %373 = memref.load %arg2[%372] : memref<32xf32, #tpu.memory_space<smem>>
    %374 = vector.broadcast %373 : f32 to vector<16x128xf32>
    %375 = arith.mulf %0, %374 : vector<16x128xf32>
    %c1_i32_75 = arith.constant 1 : i32
    %376 = arith.addi %350, %c1_i32_75 : i32
    %377 = arith.index_cast %376 : i32 to index
    %378 = memref.load %arg3[%377] : memref<32xf32, #tpu.memory_space<smem>>
    %379 = vector.broadcast %378 : f32 to vector<16x128xf32>
    %380 = arith.addf %375, %379 : vector<16x128xf32>
    %381 = math.tanh %380 : vector<16x128xf32>
    %382 = vector.broadcast %370 : f32 to vector<16x128xf32>
    %383 = arith.mulf %382, %381 : vector<16x128xf32>
    %384 = arith.addf %315, %383 : vector<16x128xf32>
    %c2_i32_76 = arith.constant 2 : i32
    %385 = arith.addi %350, %c2_i32_76 : i32
    %386 = arith.index_cast %385 : i32 to index
    %387 = memref.load %arg4[%386] : memref<32xf32, #tpu.memory_space<smem>>
    %c2_i32_77 = arith.constant 2 : i32
    %388 = arith.addi %350, %c2_i32_77 : i32
    %389 = arith.index_cast %388 : i32 to index
    %390 = memref.load %arg2[%389] : memref<32xf32, #tpu.memory_space<smem>>
    %391 = vector.broadcast %390 : f32 to vector<16x128xf32>
    %392 = arith.mulf %0, %391 : vector<16x128xf32>
    %c2_i32_78 = arith.constant 2 : i32
    %393 = arith.addi %350, %c2_i32_78 : i32
    %394 = arith.index_cast %393 : i32 to index
    %395 = memref.load %arg3[%394] : memref<32xf32, #tpu.memory_space<smem>>
    %396 = vector.broadcast %395 : f32 to vector<16x128xf32>
    %397 = arith.addf %392, %396 : vector<16x128xf32>
    %398 = math.tanh %397 : vector<16x128xf32>
    %399 = vector.broadcast %387 : f32 to vector<16x128xf32>
    %400 = arith.mulf %399, %398 : vector<16x128xf32>
    %401 = arith.addf %332, %400 : vector<16x128xf32>
    %c3_i32_79 = arith.constant 3 : i32
    %402 = arith.addi %350, %c3_i32_79 : i32
    %403 = arith.index_cast %402 : i32 to index
    %404 = memref.load %arg4[%403] : memref<32xf32, #tpu.memory_space<smem>>
    %c3_i32_80 = arith.constant 3 : i32
    %405 = arith.addi %350, %c3_i32_80 : i32
    %406 = arith.index_cast %405 : i32 to index
    %407 = memref.load %arg2[%406] : memref<32xf32, #tpu.memory_space<smem>>
    %408 = vector.broadcast %407 : f32 to vector<16x128xf32>
    %409 = arith.mulf %0, %408 : vector<16x128xf32>
    %c3_i32_81 = arith.constant 3 : i32
    %410 = arith.addi %350, %c3_i32_81 : i32
    %411 = arith.index_cast %410 : i32 to index
    %412 = memref.load %arg3[%411] : memref<32xf32, #tpu.memory_space<smem>>
    %413 = vector.broadcast %412 : f32 to vector<16x128xf32>
    %414 = arith.addf %409, %413 : vector<16x128xf32>
    %415 = math.tanh %414 : vector<16x128xf32>
    %416 = vector.broadcast %404 : f32 to vector<16x128xf32>
    %417 = arith.mulf %416, %415 : vector<16x128xf32>
    %418 = arith.addf %349, %417 : vector<16x128xf32>
    %c6_i32 = arith.constant 6 : i32
    %c4_i32_82 = arith.constant 4 : i32
    %419 = arith.muli %c6_i32, %c4_i32_82 : i32
    %c0_i32_83 = arith.constant 0 : i32
    %420 = arith.addi %419, %c0_i32_83 : i32
    %421 = arith.index_cast %420 : i32 to index
    %422 = memref.load %arg4[%421] : memref<32xf32, #tpu.memory_space<smem>>
    %c0_i32_84 = arith.constant 0 : i32
    %423 = arith.addi %419, %c0_i32_84 : i32
    %424 = arith.index_cast %423 : i32 to index
    %425 = memref.load %arg2[%424] : memref<32xf32, #tpu.memory_space<smem>>
    %426 = vector.broadcast %425 : f32 to vector<16x128xf32>
    %427 = arith.mulf %0, %426 : vector<16x128xf32>
    %c0_i32_85 = arith.constant 0 : i32
    %428 = arith.addi %419, %c0_i32_85 : i32
    %429 = arith.index_cast %428 : i32 to index
    %430 = memref.load %arg3[%429] : memref<32xf32, #tpu.memory_space<smem>>
    %431 = vector.broadcast %430 : f32 to vector<16x128xf32>
    %432 = arith.addf %427, %431 : vector<16x128xf32>
    %433 = math.tanh %432 : vector<16x128xf32>
    %434 = vector.broadcast %422 : f32 to vector<16x128xf32>
    %435 = arith.mulf %434, %433 : vector<16x128xf32>
    %436 = arith.addf %367, %435 : vector<16x128xf32>
    %c1_i32_86 = arith.constant 1 : i32
    %437 = arith.addi %419, %c1_i32_86 : i32
    %438 = arith.index_cast %437 : i32 to index
    %439 = memref.load %arg4[%438] : memref<32xf32, #tpu.memory_space<smem>>
    %c1_i32_87 = arith.constant 1 : i32
    %440 = arith.addi %419, %c1_i32_87 : i32
    %441 = arith.index_cast %440 : i32 to index
    %442 = memref.load %arg2[%441] : memref<32xf32, #tpu.memory_space<smem>>
    %443 = vector.broadcast %442 : f32 to vector<16x128xf32>
    %444 = arith.mulf %0, %443 : vector<16x128xf32>
    %c1_i32_88 = arith.constant 1 : i32
    %445 = arith.addi %419, %c1_i32_88 : i32
    %446 = arith.index_cast %445 : i32 to index
    %447 = memref.load %arg3[%446] : memref<32xf32, #tpu.memory_space<smem>>
    %448 = vector.broadcast %447 : f32 to vector<16x128xf32>
    %449 = arith.addf %444, %448 : vector<16x128xf32>
    %450 = math.tanh %449 : vector<16x128xf32>
    %451 = vector.broadcast %439 : f32 to vector<16x128xf32>
    %452 = arith.mulf %451, %450 : vector<16x128xf32>
    %453 = arith.addf %384, %452 : vector<16x128xf32>
    %c2_i32_89 = arith.constant 2 : i32
    %454 = arith.addi %419, %c2_i32_89 : i32
    %455 = arith.index_cast %454 : i32 to index
    %456 = memref.load %arg4[%455] : memref<32xf32, #tpu.memory_space<smem>>
    %c2_i32_90 = arith.constant 2 : i32
    %457 = arith.addi %419, %c2_i32_90 : i32
    %458 = arith.index_cast %457 : i32 to index
    %459 = memref.load %arg2[%458] : memref<32xf32, #tpu.memory_space<smem>>
    %460 = vector.broadcast %459 : f32 to vector<16x128xf32>
    %461 = arith.mulf %0, %460 : vector<16x128xf32>
    %c2_i32_91 = arith.constant 2 : i32
    %462 = arith.addi %419, %c2_i32_91 : i32
    %463 = arith.index_cast %462 : i32 to index
    %464 = memref.load %arg3[%463] : memref<32xf32, #tpu.memory_space<smem>>
    %465 = vector.broadcast %464 : f32 to vector<16x128xf32>
    %466 = arith.addf %461, %465 : vector<16x128xf32>
    %467 = math.tanh %466 : vector<16x128xf32>
    %468 = vector.broadcast %456 : f32 to vector<16x128xf32>
    %469 = arith.mulf %468, %467 : vector<16x128xf32>
    %470 = arith.addf %401, %469 : vector<16x128xf32>
    %c3_i32_92 = arith.constant 3 : i32
    %471 = arith.addi %419, %c3_i32_92 : i32
    %472 = arith.index_cast %471 : i32 to index
    %473 = memref.load %arg4[%472] : memref<32xf32, #tpu.memory_space<smem>>
    %c3_i32_93 = arith.constant 3 : i32
    %474 = arith.addi %419, %c3_i32_93 : i32
    %475 = arith.index_cast %474 : i32 to index
    %476 = memref.load %arg2[%475] : memref<32xf32, #tpu.memory_space<smem>>
    %477 = vector.broadcast %476 : f32 to vector<16x128xf32>
    %478 = arith.mulf %0, %477 : vector<16x128xf32>
    %c3_i32_94 = arith.constant 3 : i32
    %479 = arith.addi %419, %c3_i32_94 : i32
    %480 = arith.index_cast %479 : i32 to index
    %481 = memref.load %arg3[%480] : memref<32xf32, #tpu.memory_space<smem>>
    %482 = vector.broadcast %481 : f32 to vector<16x128xf32>
    %483 = arith.addf %478, %482 : vector<16x128xf32>
    %484 = math.tanh %483 : vector<16x128xf32>
    %485 = vector.broadcast %473 : f32 to vector<16x128xf32>
    %486 = arith.mulf %485, %484 : vector<16x128xf32>
    %487 = arith.addf %418, %486 : vector<16x128xf32>
    %c7_i32 = arith.constant 7 : i32
    %c4_i32_95 = arith.constant 4 : i32
    %488 = arith.muli %c7_i32, %c4_i32_95 : i32
    %c0_i32_96 = arith.constant 0 : i32
    %489 = arith.addi %488, %c0_i32_96 : i32
    %490 = arith.index_cast %489 : i32 to index
    %491 = memref.load %arg4[%490] : memref<32xf32, #tpu.memory_space<smem>>
    %c0_i32_97 = arith.constant 0 : i32
    %492 = arith.addi %488, %c0_i32_97 : i32
    %493 = arith.index_cast %492 : i32 to index
    %494 = memref.load %arg2[%493] : memref<32xf32, #tpu.memory_space<smem>>
    %495 = vector.broadcast %494 : f32 to vector<16x128xf32>
    %496 = arith.mulf %0, %495 : vector<16x128xf32>
    %c0_i32_98 = arith.constant 0 : i32
    %497 = arith.addi %488, %c0_i32_98 : i32
    %498 = arith.index_cast %497 : i32 to index
    %499 = memref.load %arg3[%498] : memref<32xf32, #tpu.memory_space<smem>>
    %500 = vector.broadcast %499 : f32 to vector<16x128xf32>
    %501 = arith.addf %496, %500 : vector<16x128xf32>
    %502 = math.tanh %501 : vector<16x128xf32>
    %503 = vector.broadcast %491 : f32 to vector<16x128xf32>
    %504 = arith.mulf %503, %502 : vector<16x128xf32>
    %505 = arith.addf %436, %504 : vector<16x128xf32>
    %c1_i32_99 = arith.constant 1 : i32
    %506 = arith.addi %488, %c1_i32_99 : i32
    %507 = arith.index_cast %506 : i32 to index
    %508 = memref.load %arg4[%507] : memref<32xf32, #tpu.memory_space<smem>>
    %c1_i32_100 = arith.constant 1 : i32
    %509 = arith.addi %488, %c1_i32_100 : i32
    %510 = arith.index_cast %509 : i32 to index
    %511 = memref.load %arg2[%510] : memref<32xf32, #tpu.memory_space<smem>>
    %512 = vector.broadcast %511 : f32 to vector<16x128xf32>
    %513 = arith.mulf %0, %512 : vector<16x128xf32>
    %c1_i32_101 = arith.constant 1 : i32
    %514 = arith.addi %488, %c1_i32_101 : i32
    %515 = arith.index_cast %514 : i32 to index
    %516 = memref.load %arg3[%515] : memref<32xf32, #tpu.memory_space<smem>>
    %517 = vector.broadcast %516 : f32 to vector<16x128xf32>
    %518 = arith.addf %513, %517 : vector<16x128xf32>
    %519 = math.tanh %518 : vector<16x128xf32>
    %520 = vector.broadcast %508 : f32 to vector<16x128xf32>
    %521 = arith.mulf %520, %519 : vector<16x128xf32>
    %522 = arith.addf %453, %521 : vector<16x128xf32>
    %c2_i32_102 = arith.constant 2 : i32
    %523 = arith.addi %488, %c2_i32_102 : i32
    %524 = arith.index_cast %523 : i32 to index
    %525 = memref.load %arg4[%524] : memref<32xf32, #tpu.memory_space<smem>>
    %c2_i32_103 = arith.constant 2 : i32
    %526 = arith.addi %488, %c2_i32_103 : i32
    %527 = arith.index_cast %526 : i32 to index
    %528 = memref.load %arg2[%527] : memref<32xf32, #tpu.memory_space<smem>>
    %529 = vector.broadcast %528 : f32 to vector<16x128xf32>
    %530 = arith.mulf %0, %529 : vector<16x128xf32>
    %c2_i32_104 = arith.constant 2 : i32
    %531 = arith.addi %488, %c2_i32_104 : i32
    %532 = arith.index_cast %531 : i32 to index
    %533 = memref.load %arg3[%532] : memref<32xf32, #tpu.memory_space<smem>>
    %534 = vector.broadcast %533 : f32 to vector<16x128xf32>
    %535 = arith.addf %530, %534 : vector<16x128xf32>
    %536 = math.tanh %535 : vector<16x128xf32>
    %537 = vector.broadcast %525 : f32 to vector<16x128xf32>
    %538 = arith.mulf %537, %536 : vector<16x128xf32>
    %539 = arith.addf %470, %538 : vector<16x128xf32>
    %c3_i32_105 = arith.constant 3 : i32
    %540 = arith.addi %488, %c3_i32_105 : i32
    %541 = arith.index_cast %540 : i32 to index
    %542 = memref.load %arg4[%541] : memref<32xf32, #tpu.memory_space<smem>>
    %c3_i32_106 = arith.constant 3 : i32
    %543 = arith.addi %488, %c3_i32_106 : i32
    %544 = arith.index_cast %543 : i32 to index
    %545 = memref.load %arg2[%544] : memref<32xf32, #tpu.memory_space<smem>>
    %546 = vector.broadcast %545 : f32 to vector<16x128xf32>
    %547 = arith.mulf %0, %546 : vector<16x128xf32>
    %c3_i32_107 = arith.constant 3 : i32
    %548 = arith.addi %488, %c3_i32_107 : i32
    %549 = arith.index_cast %548 : i32 to index
    %550 = memref.load %arg3[%549] : memref<32xf32, #tpu.memory_space<smem>>
    %551 = vector.broadcast %550 : f32 to vector<16x128xf32>
    %552 = arith.addf %547, %551 : vector<16x128xf32>
    %553 = math.tanh %552 : vector<16x128xf32>
    %554 = vector.broadcast %542 : f32 to vector<16x128xf32>
    %555 = arith.mulf %554, %553 : vector<16x128xf32>
    %556 = arith.addf %487, %555 : vector<16x128xf32>
    %c8_i32 = arith.constant 8 : i32
    %557 = arith.addf %505, %522 : vector<16x128xf32>
    %558 = arith.addf %557, %539 : vector<16x128xf32>
    %559 = arith.addf %558, %556 : vector<16x128xf32>
    %c0_108 = arith.constant 0 : index
    %560 = memref.load %arg5[%c0_108] : memref<1xf32, #tpu.memory_space<smem>>
    %561 = vector.broadcast %560 : f32 to vector<16x128xf32>
    %562 = arith.addf %559, %561 : vector<16x128xf32>
    %563 = math.tanh %562 : vector<16x128xf32>
    %c0_109 = arith.constant 0 : index
    %c0_110 = arith.constant 0 : index
    %564 = vector.load %arg6[%c0_109, %c0_110] : memref<128x128xf32, #tpu.memory_space<vmem>>, vector<128x128xf32>
    %cst_111 = arith.constant dense<0.000000e+00> : vector<16x128xf32>
    %565 = tpu.matmul %563, %564, %cst_111 {dimension_numbers = #tpu.dot_dimension_numbers<[1], [0], [0], [1], [0, 0, 1, 1], [], []>} : vector<16x128xf32>, vector<128x128xf32>, vector<16x128xf32> -> vector<16x128xf32>
    %c0_112 = arith.constant 0 : index
    %c0_113 = arith.constant 0 : index
    %566 = vector.load %arg7[%c0_112, %c0_113] : memref<128x128xf32, #tpu.memory_space<vmem>>, vector<128x128xf32>
    %cst_114 = arith.constant dense<0.000000e+00> : vector<16x128xf32>
    %567 = tpu.matmul %563, %566, %cst_114 {dimension_numbers = #tpu.dot_dimension_numbers<[1], [0], [0], [1], [0, 0, 1, 1], [], []>} : vector<16x128xf32>, vector<128x128xf32>, vector<16x128xf32> -> vector<16x128xf32>
    %c0_115 = arith.constant 0 : index
    %c0_116 = arith.constant 0 : index
    %568 = vector.load %arg9[%c0_115, %c0_116] : memref<16x128xf32, #tpu.memory_space<vmem>>, vector<16x128xf32>
    tpu.vector_store %arg9[%c0_115, %c0_116], %565 {strides = array<i32>} : memref<16x128xf32, #tpu.memory_space<vmem>>, vector<16x128xf32>,
    %569 = tpu.iota {dimensions = array<i32: 1>} : vector<16x128xi32>
    %cst_117 = arith.constant 0.000000e+00 : f32
    %570 = vector.broadcast %cst_117 : f32 to vector<16x128xf32>
    %c0_i32_118 = arith.constant 0 : i32
    %571 = vector.broadcast %c0_i32_118 : i32 to vector<16x128xi32>
    %572 = arith.cmpi sge, %569, %571 : vector<16x128xi32>
    %c50_i32 = arith.constant 50 : i32
    %573 = vector.broadcast %c50_i32 : i32 to vector<16x128xi32>
    %574 = arith.cmpi slt, %569, %573 : vector<16x128xi32>
    %575 = arith.andi %572, %574 : vector<16x128xi1>
    %cst_119 = arith.constant 0xFF800000 : f32
    %576 = vector.broadcast %cst_119 : f32 to vector<16x128xf32>
    %577 = arith.select %575, %567, %576 : vector<16x128xi1>, vector<16x128xf32>
    %cst_120 = arith.constant dense<0xFF800000> : vector<16xf32>
    %578 = vector.multi_reduction <maximumf>, %577, %cst_120 [1] : vector<16x128xf32> to vector<16xf32>
    %579 = vector.shape_cast %578 : vector<16xf32> to vector<16x1xf32>
    %580 = vector.shape_cast %579 : vector<16x1xf32> to vector<16x1xf32>
    %581 = vector.broadcast %580 : vector<16x1xf32> to vector<16x128xf32>
    %582 = arith.select %575, %581, %570 : vector<16x128xi1>, vector<16x128xf32>
    %c50_i32_121 = arith.constant 50 : i32
    %583 = vector.broadcast %c50_i32_121 : i32 to vector<16x128xi32>
    %584 = arith.cmpi sge, %569, %583 : vector<16x128xi32>
    %c100_i32 = arith.constant 100 : i32
    %585 = vector.broadcast %c100_i32 : i32 to vector<16x128xi32>
    %586 = arith.cmpi slt, %569, %585 : vector<16x128xi32>
    %587 = arith.andi %584, %586 : vector<16x128xi1>
    %cst_122 = arith.constant 0xFF800000 : f32
    %588 = vector.broadcast %cst_122 : f32 to vector<16x128xf32>
    %589 = arith.select %587, %567, %588 : vector<16x128xi1>, vector<16x128xf32>
    %cst_123 = arith.constant dense<0xFF800000> : vector<16xf32>
    %590 = vector.multi_reduction <maximumf>, %589, %cst_123 [1] : vector<16x128xf32> to vector<16xf32>
    %591 = vector.shape_cast %590 : vector<16xf32> to vector<16x1xf32>
    %592 = vector.shape_cast %591 : vector<16x1xf32> to vector<16x1xf32>
    %593 = vector.broadcast %592 : vector<16x1xf32> to vector<16x128xf32>
    %594 = arith.select %587, %593, %582 : vector<16x128xi1>, vector<16x128xf32>
    %c100_i32_124 = arith.constant 100 : i32
    %595 = vector.broadcast %c100_i32_124 : i32 to vector<16x128xi32>
    %596 = arith.cmpi sge, %569, %595 : vector<16x128xi32>
    %c104_i32 = arith.constant 104 : i32
    %597 = vector.broadcast %c104_i32 : i32 to vector<16x128xi32>
    %598 = arith.cmpi slt, %569, %597 : vector<16x128xi32>
    %599 = arith.andi %596, %598 : vector<16x128xi1>
    %cst_125 = arith.constant 0xFF800000 : f32
    %600 = vector.broadcast %cst_125 : f32 to vector<16x128xf32>
    %601 = arith.select %599, %567, %600 : vector<16x128xi1>, vector<16x128xf32>
    %cst_126 = arith.constant dense<0xFF800000> : vector<16xf32>
    %602 = vector.multi_reduction <maximumf>, %601, %cst_126 [1] : vector<16x128xf32> to vector<16xf32>
    %603 = vector.shape_cast %602 : vector<16xf32> to vector<16x1xf32>
    %604 = vector.shape_cast %603 : vector<16x1xf32> to vector<16x1xf32>
    %605 = vector.broadcast %604 : vector<16x1xf32> to vector<16x128xf32>
    %606 = arith.select %599, %605, %594 : vector<16x128xi1>, vector<16x128xf32>
    %c104_i32_127 = arith.constant 104 : i32
    %607 = vector.broadcast %c104_i32_127 : i32 to vector<16x128xi32>
    %608 = arith.cmpi sge, %569, %607 : vector<16x128xi32>
    %c108_i32 = arith.constant 108 : i32
    %609 = vector.broadcast %c108_i32 : i32 to vector<16x128xi32>
    %610 = arith.cmpi slt, %569, %609 : vector<16x128xi32>
    %611 = arith.andi %608, %610 : vector<16x128xi1>
    %cst_128 = arith.constant 0xFF800000 : f32
    %612 = vector.broadcast %cst_128 : f32 to vector<16x128xf32>
    %613 = arith.select %611, %567, %612 : vector<16x128xi1>, vector<16x128xf32>
    %cst_129 = arith.constant dense<0xFF800000> : vector<16xf32>
    %614 = vector.multi_reduction <maximumf>, %613, %cst_129 [1] : vector<16x128xf32> to vector<16xf32>
    %615 = vector.shape_cast %614 : vector<16xf32> to vector<16x1xf32>
    %616 = vector.shape_cast %615 : vector<16x1xf32> to vector<16x1xf32>
    %617 = vector.broadcast %616 : vector<16x1xf32> to vector<16x128xf32>
    %618 = arith.select %611, %617, %606 : vector<16x128xi1>, vector<16x128xf32>
    %619 = arith.subf %567, %618 : vector<16x128xf32>
    %620 = math.exp %619 : vector<16x128xf32>
    %c0_130 = arith.constant 0 : index
    %c0_131 = arith.constant 0 : index
    %621 = vector.load %arg8[%c0_130, %c0_131] : memref<128x128xf32, #tpu.memory_space<vmem>>, vector<128x128xf32>
    %cst_132 = arith.constant dense<0.000000e+00> : vector<16x128xf32>
    %622 = tpu.matmul %620, %621, %cst_132 {dimension_numbers = #tpu.dot_dimension_numbers<[1], [0], [0], [1], [0, 0, 1, 1], [], []>} : vector<16x128xf32>, vector<128x128xf32>, vector<16x128xf32> -> vector<16x128xf32>
    %623 = arith.subf %567, %618 : vector<16x128xf32>
    %624 = math.log %622 : vector<16x128xf32>
    %625 = arith.subf %623, %624 : vector<16x128xf32>
    %c0_133 = arith.constant 0 : index
    %c0_134 = arith.constant 0 : index
    %626 = vector.load %arg10[%c0_133, %c0_134] : memref<16x128xf32, #tpu.memory_space<vmem>>, vector<16x128xf32>
    tpu.vector_store %arg10[%c0_133, %c0_134], %625 {strides = array<i32>} : memref<16x128xf32, #tpu.memory_space<vmem>>, vector<16x128xf32>,
    return
  }
  func.func @transform_0(%arg0: i32) -> (i32, i32) {
    %c0_i32 = arith.constant 0 : i32
    %c0_i32_0 = arith.constant 0 : i32
    return %arg0, %c0_i32 : i32, i32
  }
  func.func @transform_1(%arg0: i32) -> i32 {
    %c0_i32 = arith.constant 0 : i32
    %c0_i32_0 = arith.constant 0 : i32
    return %c0_i32 : i32
  }
  func.func @transform_2(%arg0: i32) -> i32 {
    %c0_i32 = arith.constant 0 : i32
    %c0_i32_0 = arith.constant 0 : i32
    return %c0_i32 : i32
  }
  func.func @transform_3(%arg0: i32) -> i32 {
    %c0_i32 = arith.constant 0 : i32
    %c0_i32_0 = arith.constant 0 : i32
    return %c0_i32 : i32
  }
  func.func @transform_4(%arg0: i32) -> i32 {
    %c0_i32 = arith.constant 0 : i32
    %c0_i32_0 = arith.constant 0 : i32
    return %c0_i32 : i32
  }
  func.func @transform_5(%arg0: i32) -> (i32, i32) {
    %c0_i32 = arith.constant 0 : i32
    %c0_i32_0 = arith.constant 0 : i32
    %c0_i32_1 = arith.constant 0 : i32
    return %c0_i32, %c0_i32_0 : i32, i32
  }
  func.func @transform_6(%arg0: i32) -> (i32, i32) {
    %c0_i32 = arith.constant 0 : i32
    %c0_i32_0 = arith.constant 0 : i32
    %c0_i32_1 = arith.constant 0 : i32
    return %c0_i32, %c0_i32_0 : i32, i32
  }
  func.func @transform_7(%arg0: i32) -> (i32, i32) {
    %c0_i32 = arith.constant 0 : i32
    %c0_i32_0 = arith.constant 0 : i32
    %c0_i32_1 = arith.constant 0 : i32
    return %c0_i32, %c0_i32_0 : i32, i32
  }
  func.func @transform_8(%arg0: i32) -> (i32, i32) {
    %c0_i32 = arith.constant 0 : i32
    %c0_i32_0 = arith.constant 0 : i32
    return %arg0, %c0_i32 : i32, i32
  }
  func.func @transform_9(%arg0: i32) -> (i32, i32) {
    %c0_i32 = arith.constant 0 : i32
    %c0_i32_0 = arith.constant 0 : i32
    return %arg0, %c0_i32 : i32, i32
  }
}

</mosaic_0001>

<bundles_post_ra>
// kernel: tpu_custom_call.1
= control target key start
LH: loop header
LB: loop body
LE: loop exit
PB: predicated region body
PF: predicated region fallthrough
CT: control target
= control target key end

     0   :  { %s3409_s0 = inlined_call_operand.hbm [shape: f32[32,128], index: 0, kind: input, shape index: {}]   ;;  %s3410_s1 = inlined_call_operand.vmem [shape: f32[32], index: 1, kind: input, shape index: {}]   ;;  %s3411_s2 = inlined_call_operand.vmem [shape: f32[32], index: 2, kind: input, shape index: {}]   ;;  %s3412_s3 = inlined_call_operand.vmem [shape: f32[32], index: 3, kind: input, shape index: {}]   ;;  %s3413_s4 = inlined_call_operand.<no memory space> [shape: f32[1], index: 4, kind: input, shape index: {}]   ;;  %s3414_s5 = inlined_call_operand.hbm [shape: f32[128,128], index: 5, kind: input, shape index: {}]   ;;  %s3415_s6 = inlined_call_operand.hbm [shape: f32[128,128], index: 6, kind: input, shape index: {}]   ;;  %s3416_s7 = inlined_call_operand.hbm [shape: f32[128,128], index: 7, kind: input, shape index: {}]   ;;  %s3417_s8 = inlined_call_operand.hbm [shape: f32[32,128], index: 8, kind: output, shape index: {0}]   ;;  %s3418_s9 = inlined_call_operand.hbm [shape: f32[32,128], index: 9, kind: output, shape index: {1}]  }
   0x1   :  { %3424 = sst [smem:[#allocation26_spill]] %s3409_s0 }
   0x2   :  { %3425 = sst [smem:[#allocation27_spill]] %s3410_s1 }
   0x3   :  { %3426 = sst [smem:[#allocation28_spill]] %s3411_s2 }
   0x4   :  { %3427 = sst [smem:[#allocation29_spill]] %s3412_s3 }
   0x5   :  { %3428 = sst [smem:[#allocation30_spill]] %s3414_s5 }
   0x6   :  { %15 = sst [smem:[#allocation2]] %s3413_s4 }
   0x7   :  { %16 = vsyncpa [#allocation4], 0 }
   0x8   :  { %18 = vsyncpa [#allocation4 + $0x1], 0 }
   0x9   :  { %19 = vsyncpa [#allocation6], 0 }
   0xa   :  { %20 = vsyncpa [#allocation9], 0 }
   0xb   :  { %21 = vsyncpa [#allocation12], 0 }
   0xc   :  { %22 = vsyncpa [#allocation15], 0 }
   0xd   :  { %23 = vsyncpa [#allocation5], 0 }
   0xe   :  { %25 = vsyncpa [#allocation5 + $0x1], 0 }
   0xf   :  { %26 = vsyncpa [#allocation18], 0 }
  0x10   :  { %28 = vsyncpa [#allocation18 + $0x1], 0  ;;  %s2490_s11 = smov 0   ;;  %s2492_s12 = smov 0  }
  0x11   :  { %s2494_s13 = smov 0   ;;  %s2496_s14 = smov 0  }
  0x12 LB: > { %s3429_s2 = sld [smem:[#allocation28_spill]]  ;;  %s2514_s17 = sadd.s32 4294967295, %s2422_s14   ;;  %s2422_s14 = sphi %s2496_s14, %s3466_s14   ;;  %s2418_s13 = sphi %s2494_s13, %s3465_s13   ;;  %s2414_s12 = sphi %s2492_s12, %s3464_s12   ;;  %s2410_s11 = sphi %s2490_s11, %s3463_s11  }
  0x13   : > { %p1511_p0 = scmp.ge.s32.totalorder %s2422_s14, 1  ;;  %p3419_p1 = scmp.eq.s32.totalorder %s2514_s17, 0 }
  0x14   : > { %p264_p2 = scmp.lt.s32.totalorder %s2422_s14, 3  ;;  %s2424_s19 = smov [#allocation11]  }
  0x15   : > { %s312_s20 = sshll.u32 %s2424_s19, 4  ;;  %s3432_s1 = sld [smem:[#allocation27_spill]]  ;;  %s2526_s20 = int_to_ptr.vmem [resolvable:$true] %s312_s20 }
  0x16   : > { %p2519_p3 = pnand %p1511_p0, %p264_p2  ;;  %s3433_s3 = sld [smem:[#allocation29_spill]] }
  0x18   : > { %s288_s16 = sshll.u32 %s3429_s2, 4  ;;  %p1921_p5 = pneg %p2519_p3  ;;  %s289_s16 = int_to_ptr.vmem [resolvable:$true] %s288_s16 }
  0x19   : > { %s3430_s18 = scalar_select %p2519_p3, 1, 0 }
  0x1a   : > { %p2530_p6 = pnand %p1921_p5, %p3419_p1  ;;  %s2149_s28 = scalar_lea.vmem %s289_s16, 16 }
  0x1b   : > { %s277_s24 = sshll.u32 %s3432_s1, 4  ;;  %p2150_p7 = scmp.ne.s32.totalorder %s289_s16, %s2149_s28  ;;  %s2537_s24 = int_to_ptr.vmem [resolvable:$true] %s277_s24 }
  0x1c   : > { %s299_s27 = sshll.u32 %s3433_s3, 4  ;;  %p2544_p8 = pneg %p2530_p6  ;;  %s300_s27 = int_to_ptr.vmem [resolvable:$true] %s299_s27 }
  0x1d   : > { %p2157_p11 = scmp.lt.s32.totalorder %s289_s16, %s289_s16  ;;  %p2158_p12 = scmp.lt.s32.totalorder %s2149_s28, %s2149_s28 }
  0x1e   : > { %p2152_p9 = pnand %p2544_p8, %p2150_p7 }
  0x1f   : > { %p2159_p13 = por %p2158_p12, %p2157_p11 }
  0x20   : > { %p2153_p10 = pneg %p2152_p9 }
  0x22   : > { %p2160_p0 = pnand %p2159_p13, %p2153_p10 }
  0x24   : > { %2163 = shalt.err (!%p2160_p0)
}
  0x25   : > { %s2425_s30 = smov [#allocation8]   ;;  %s3435_s5 = sld [smem:[#allocation30_spill]] }
  0x26   : > { %1927 = dma.vmem_to_smem (!%p2530_p6), %s289_s16, 16, %s2425_s30, [#allocation9]  }
  0x2b   : > { %s2164_s15 = scalar_lea.hbm %s3435_s5, 2048 }
  0x2c   : > { %p2165_p2 = scmp.ne.s32.totalorder %s3435_s5, %s2164_s15  ;;  %p2171_p9 = scmp.lt.u32.totalorder %s2164_s15, %s3435_s5 }
  0x2e   : > { %p2167_p5 = pnand %p2165_p2, %p2544_p8 }
  0x30   : > { %p2168_p7 = pneg %p2167_p5 }
  0x32   : > { %p2173_p10 = pnand %p2171_p9, %p2168_p7 }
  0x34   : > { %2176 = shalt.err (!%p2173_p10)
}
  0x35   : > { %s2177_s16 = scalar_lea.vmem %s2526_s20, 2048  ;;  %p2185_p0 = scmp.lt.s32.totalorder %s2526_s20, %s2526_s20 }
  0x36   : > { %p2178_p11 = scmp.ne.s32.totalorder %s2526_s20, %s2177_s16  ;;  %p2186_p4 = scmp.lt.s32.totalorder %s2177_s16, %s2177_s16 }
  0x38   : > { %p2180_p12 = pnand %p2178_p11, %p2544_p8  ;;  %p2187_p2 = por %p2186_p4, %p2185_p0 }
  0x3a   : > { %p2181_p13 = pneg %p2180_p12 }
  0x3c   : > { %p2188_p5 = pnand %p2187_p2, %p2181_p13 }
  0x3e   : > { %2191 = shalt.err (!%p2188_p5)
}
  0x3f   : > { %s3421_s26 = smov 128   ;;  %s3422_s28 = smov 8  }
  0x40   : > { %1933 = dma.hbm_to_vmem [thread:$0]  (!%p2530_p6), %s3435_s5, 2048, %s2526_s20, [#allocation12], %s3421_s26, %s3421_s26, %s3422_s28  }
  0x41   : > { %s2192_s4 = scalar_lea.vmem %s2537_s24, 16  ;;  %p2200_p10 = scmp.lt.s32.totalorder %s2537_s24, %s2537_s24 }
  0x42   : > { %p2193_p4 = scmp.ne.s32.totalorder %s2537_s24, %s2192_s4  ;;  %p2201_p11 = scmp.lt.s32.totalorder %s2192_s4, %s2192_s4 }
  0x44   : > { %p2195_p7 = pnand %p2193_p4, %p2544_p8  ;;  %p2202_p12 = por %p2201_p11, %p2200_p10 }
  0x46   : > { %p2196_p9 = pneg %p2195_p7 }
  0x48   : > { %p2203_p13 = pnand %p2202_p12, %p2196_p9 }
  0x4a   : > { %2206 = shalt.err (!%p2203_p13)
}
  0x4b   : > { %s2428_s15 = smov [#allocation7]   ;;  %s2207_s20 = scalar_lea.vmem %s300_s27, 16 }
  0x4c   : > { %1924 = dma.vmem_to_smem (!%p2530_p6), %s2537_s24, 16, %s2428_s15, [#allocation6]  }
  0x4d   : > { %p2208_p0 = scmp.ne.s32.totalorder %s300_s27, %s2207_s20  ;;  %p2215_p4 = scmp.lt.s32.totalorder %s300_s27, %s300_s27 }
  0x4e   : > { %p2216_p7 = scmp.lt.s32.totalorder %s2207_s20, %s2207_s20 }
  0x4f   : > { %p2210_p2 = pnand %p2208_p0, %p2544_p8 }
  0x50   : > { %p2217_p9 = por %p2216_p7, %p2215_p4 }
  0x51   : > { %p2211_p5 = pneg %p2210_p2 }
  0x53   : > { %p2218_p10 = pnand %p2217_p9, %p2211_p5 }
  0x55   : > { %2221 = shalt.err (!%p2218_p10)
}
  0x56   : > { %s2429_s23 = smov [#allocation10]   ;;  %s2430_s24 = smov [#allocation13]  }
  0x57   : > { %1930 = dma.vmem_to_smem (!%p2530_p6), %s300_s27, 16, %s2429_s23, [#allocation9]  }
  0x58   : > { %s325_s25 = sshll.u32 %s2430_s24, 4  ;;  %s2431_s16 = smov [#allocation14]   ;;  %s326_s25 = int_to_ptr.vmem [resolvable:$true] %s325_s25 }
  0x59   : > { %s338_s30 = sshll.u32 %s2431_s16, 4  ;;  %s2222_s15 = scalar_lea.hbm %s3415_s6, 2048  ;;  %s2595_s30 = int_to_ptr.vmem [resolvable:$true] %s338_s30 }
  0x5a   : > { %p2223_p11 = scmp.ne.s32.totalorder %s3415_s6, %s2222_s15  ;;  %p2229_p0 = scmp.lt.u32.totalorder %s2222_s15, %s3415_s6 }
  0x5c   : > { %p2225_p12 = pnand %p2223_p11, %p2544_p8 }
  0x5e   : > { %p2226_p13 = pneg %p2225_p12 }
  0x60   : > { %p2231_p2 = pnand %p2229_p0, %p2226_p13 }
  0x62   : > { %2234 = shalt.err (!%p2231_p2)
}
  0x63   : > { %s2235_s23 = scalar_lea.vmem %s326_s25, 2048  ;;  %p2243_p9 = scmp.lt.s32.totalorder %s326_s25, %s326_s25 }
  0x64   : > { %p2236_p5 = scmp.ne.s32.totalorder %s326_s25, %s2235_s23  ;;  %p2244_p10 = scmp.lt.s32.totalorder %s2235_s23, %s2235_s23 }
  0x66   : > { %p2238_p4 = pnand %p2236_p5, %p2544_p8  ;;  %p2245_p1 = por %p2244_p10, %p2243_p9 }
  0x68   : > { %p2239_p7 = pneg %p2238_p4 }
  0x6a   : > { %p2246_p3 = pnand %p2245_p1, %p2239_p7 }
  0x6c   : > { %2249 = shalt.err (!%p2246_p3)
}
  0x6d   : > { %1936 = dma.hbm_to_vmem [thread:$0]  (!%p2530_p6), %s3415_s6, 2048, %s326_s25, [#allocation12], %s3421_s26, %s3421_s26, %s3422_s28  }
  0x6e   : > { %s2250_s15 = scalar_lea.hbm %s3416_s7, 2048 }
  0x6f   : > { %p2251_p11 = scmp.ne.s32.totalorder %s3416_s7, %s2250_s15  ;;  %p2257_p12 = scmp.lt.u32.totalorder %s2250_s15, %s3416_s7 }
  0x71   : > { %p2253_p1 = pnand %p2251_p11, %p2544_p8 }
  0x73   : > { %p2254_p3 = pneg %p2253_p1 }
  0x75   : > { %p2259_p13 = pnand %p2257_p12, %p2254_p3 }
  0x77   : > { %2262 = shalt.err (!%p2259_p13)
}
  0x78   : > { %s2263_s25 = scalar_lea.vmem %s2595_s30, 2048  ;;  %p2271_p4 = scmp.lt.s32.totalorder %s2595_s30, %s2595_s30 }
  0x79   : > { %p2264_p0 = scmp.ne.s32.totalorder %s2595_s30, %s2263_s25  ;;  %p2272_p7 = scmp.lt.s32.totalorder %s2263_s25, %s2263_s25 }
  0x7b   : > { %p2266_p2 = pnand %p2264_p0, %p2544_p8  ;;  %p2273_p9 = por %p2272_p7, %p2271_p4 }
  0x7d   : > { %p2267_p5 = pneg %p2266_p2 }
  0x7f   : > { %p2274_p10 = pnand %p2273_p9, %p2267_p5 }
  0x81   : > { %2277 = shalt.err (!%p2274_p10)
}
  0x82   : > { %1939 = dma.hbm_to_vmem [thread:$0]  (!%p2530_p6), %s3416_s7, 2048, %s2595_s30, [#allocation15], %s3421_s26, %s3421_s26, %s3422_s28  }
  0x83   : > { %s1510_s21 = sadd.s32 4294967294, %s2422_s14   ;;  %s2646_s29 = sadd.s32 1, %s2422_s14  }
  0x84   : > { %s38_s16 = ssub.s32 %s2422_s14, %s2646_s29  ;;  %s41_s10 = sadd.s32 1, %s2418_s13 }
  0x85   : > { %p39_p8 = scmp.eq.s32.totalorder %s38_s16, 0  ;;  %p48_p11 = scmp.ne.s32.totalorder %s2418_s13, %s2414_s12 }
  0x86   : > { %p49_p1 = scmp.eq.s32.totalorder %s2422_s14, 0  ;;  %p54_p3 = scmp.ne.s32.totalorder %s2414_s12, %s2410_s11 }
  0x87   : > { %s2657_s4 = scalar_select %p39_p8, %s2418_s13, %s41_s10  }
  0x88   : > { %p2659_p12 = por %p49_p1, %p48_p11  ;;  %p3437_p13 = scmp.eq.s32.totalorder %s2514_s17, 0 }
  0x89   : > { %p225_p0 = scmp.eq.s32.totalorder %s2514_s17, 1  ;;  %p231_p2 = scmp.eq.s32.totalorder %s1510_s21, 1 }
  0x8a   : > { %p2665_p6 = por %p3437_p13, %p54_p3  ;;  %p1957_p5 = scmp.lt.s32.totalorder %s2422_s14, 2 }
  0x8b   : > { %s352_s19 = sand.u32 1, %s2418_s13   ;;  %p2672_p4 = por %p225_p0, %p48_p11 }
  0x8c   : > { %p2676_p7 = por %p231_p2, %p54_p3  ;;  %s1519_s27 = sshll.u32 %s352_s19, 4 }
  0x8d   : > { %s3439_s22 = scalar_select %p2672_p4, 1, 0 }
  0x8e   : > { %s3440_s20 = scalar_select %p2676_p7, 1, 0 }
  0x8f   : > { %s1633_s25 = sshll.u32 %s2422_s14, 8  ;;  %s3441_s0 = sld [smem:[#allocation26_spill]] }
  0x90   : > { %s356_s21 = scalar_lea.vmem [#allocation3], %s1519_s27  ;;  %p2690_p9 = pnand %p1957_p5, %p2659_p12 }
  0x91   : > { %s363_s10 = sshll.u32 %s356_s21, 4  ;;  %s2694_s28 = scalar_lea.sflag [#allocation4], %s352_s19  ;;  %s2686_s10 = int_to_ptr.vmem [resolvable:$true] %s363_s10 }
  0x92   : > { %p2280_p8 = pneg %p2690_p9 }
  0x95   : > { %s2684_s16 = scalar_lea.hbm %s3441_s0, %s1633_s25  ;;  %s2283_s15 = scalar_lea.hbm %s3441_s0, 512 }
  0x96   : > { %s2278_s23 = scalar_lea.hbm %s2684_s16, 256  ;;  %p2284_p3 = scmp.lt.u32.totalorder %s2684_s16, %s3441_s0 }
  0x97   : > { %p2279_p10 = scmp.ne.s32.totalorder %s2684_s16, %s2278_s23  ;;  %p2285_p12 = scmp.lt.u32.totalorder %s2283_s15, %s2278_s23 }
  0x98   : > { %p2287_p0 = scmp.lt.u32.totalorder %s2278_s23, %s2684_s16 }
  0x99   : > { %p2281_p11 = pnand %p2280_p8, %p2279_p10  ;;  %p2286_p13 = por %p2285_p12, %p2284_p3 }
  0x9b   : > { %p2282_p1 = pneg %p2281_p11  ;;  %p2288_p2 = por %p2287_p0, %p2286_p13 }
  0x9d   : > { %p2289_p5 = pnand %p2288_p2, %p2282_p1 }
  0x9f   : > { %2292 = shalt.err (!%p2289_p5)
}
  0xa0   : > { %s2293_s19 = scalar_lea.vmem %s2686_s10, 256  ;;  %s2432_s27 = smov [#allocation3]  }
  0xa1   : > { %p2294_p10 = scmp.ne.s32.totalorder %s2686_s10, %s2293_s19  ;;  %s2298_s25 = sshll.u32 %s2432_s27, 4  ;;  %s2299_s25 = int_to_ptr.vmem [resolvable:$false] %s2298_s25 }
  0xa2   : > { %s2300_s24 = scalar_lea.vmem %s2299_s25, 512  ;;  %p2301_p4 = scmp.lt.s32.totalorder %s2686_s10, %s2299_s25 }
  0xa3   : > { %p2296_p11 = pnand %p2294_p10, %p2280_p8  ;;  %p2302_p3 = scmp.lt.s32.totalorder %s2300_s24, %s2293_s19 }
  0xa5   : > { %p2297_p7 = pneg %p2296_p11  ;;  %p2303_p12 = por %p2302_p3, %p2301_p4 }
  0xa7   : > { %p2304_p13 = pnand %p2303_p12, %p2297_p7 }
  0xa9   : > { %2307 = shalt.err (!%p2304_p13)
}
  0xaa   : > { %s3443_s23 = smov 8   ;;  %s3444_s15 = smov 128  }
  0xab   : > { %1943 = dma.hbm_to_vmem [thread:$0]  (!%p2690_p9), %s2684_s16, 256, %s2686_s10, %s2694_s28, %s3444_s15, %s3444_s15, %s3443_s23  }
  0xac   : > { %p3445_p8 = scmp.ne.s32.totalorder %s3430_s18, 0 }
  0xad   : > { %s2728_s21 = sand.u32 (!%p3445_p8), 1, %s2414_s12  }
  0xae   : > { %375 = sbr.rel (%p3445_p8) target bundleno = 956 (0x3bc), region = 52  ;;  %s2731_s19 = sshll.u32 (!%p3445_p8), %s2728_s21, 4 }
  0xaf   : > { %s378_s26 = scalar_lea.sflag (!%p3445_p8), [#allocation4], %s2728_s21  ;;  %s2735_s27 = scalar_lea.vmem (!%p3445_p8), [#allocation3], %s2731_s19 }
  0xb5   : > { %2381 = dma.done.wait (%p2665_p6), %s378_s26, 256  }
  0xb6   : > { %2383 = vsyncadd (%p2665_p6), %s378_s26, 4294967040  ;;  %p3446_p4 = scmp.eq.s32.totalorder %s2514_s17, 0 }
  0xb8   : > { %2385 = dma.done.wait (%p3446_p4), [#allocation6], 16   ;;  %p3447_p7 = pmov %p3446_p4 }
  0xb9   : > { %p3448_p9 = pmov %p3446_p4 }
  0xba   : > { %2387 = vsyncadd (%p3447_p7), [#allocation6], 4294967280 }
  0xbb   : > { %2389 = dma.done.wait (%p3448_p9), [#allocation9], 32   ;;  %p3449_p1 = pmov %p3446_p4 }
  0xbd   : > { %2391 = vsyncadd (%p3449_p1), [#allocation9], 4294967264  ;;  %p3450_p0 = pmov %p3449_p1 }
  0xbf   : > { %2393 = dma.done.wait (%p3450_p0), [#allocation12], 4096   ;;  %p3451_p2 = pmov %p3450_p0 }
  0xc0   : > { %p3452_p6 = pmov %p3450_p0 }
  0xc1   : > { %2395 = vsyncadd (%p3451_p2), [#allocation12], 4294963200 }
  0xc2   : > { %2397 = dma.done.wait (%p3452_p6), [#allocation15], 2048   ;;  %p3453_p5 = pmov %p3450_p0 }
  0xc4   : > { %2399 = vsyncadd (%p3453_p5), [#allocation15], 4294965248 }
  0xc5   : > { %410 = sfence }
  0xc6   : > { %v1066_v0 = vld [vmem:[#allocation13] sm:$0xff]  ;;  %v1067_v1 = vld [vmem:[#allocation13 + $0x8] sm:$0xff]  ;;  %v1068_v2 = vld [vmem:[#allocation13 + $0x10] sm:$0xff]  ;;  %s452_s18 = sld [smem:[#allocation7]]  ;;  %s1533_s30 = sld [smem:[#allocation7 + $0x1]] }
  0xc7   : > { %v1827_v3 = vpack.c.bf16 %v1067_v1, %v1066_v0  ;;  %v1069_v4 = vld [vmem:[#allocation13 + $0x18] sm:$0xff]  ;;  %v1070_v6 = vld [vmem:[#allocation13 + $0x20] sm:$0xff]  ;;  %v1071_v7 = vld [vmem:[#allocation13 + $0x28] sm:$0xff]  ;;  %s2757_s28 = sld [smem:[#allocation8]]  ;;  %s2765_s16 = sld [smem:[#allocation8 + $0x1]] }
  0xc8   : > { %v1831_v5 = vpack.c.bf16 %v1069_v4, %v1068_v2  ;;  %v1835_v8 = vpack.c.bf16 %v1071_v7, %v1070_v6  ;;  %v2760_v9 = vld [vmem:[%s2735_s27] sm:$0xff]  ;;  %v2763_v10 = vld [vmem:[%s2735_s27 + $0x8] sm:$0xff]  ;;  %s2767_s10 = sld [smem:[#allocation7 + $0x2]]  ;;  %s2774_s24 = sld [smem:[#allocation7 + $0x3]] }
  0xc9   : > { %1828 = vmatprep.subr.bf16.mxu1 %v1827_v3  ;;  %v1072_v11 = vld [vmem:[#allocation13 + $0x30] sm:$0xff]  ;;  %v1073_v12 = vld [vmem:[#allocation13 + $0x38] sm:$0xff]  ;;  %s2769_s25 = sld [smem:[#allocation8 + $0x2]]  ;;  %s2776_s23 = sld [smem:[#allocation8 + $0x3]]  ;;  %v1074_v18 = vld [vmem:[#allocation13 + $0x40] sm:$0xff] }
  0xca   : > { %1830 = vmatpush3.bf16.msra.mxu1 %v1827_v3  ;;  %v1839_v17 = vpack.c.bf16 %v1073_v12, %v1072_v11  ;;  %s2778_s15 = sld [smem:[#allocation7 + $0x4]]  ;;  %v1075_v19 = vld [vmem:[#allocation13 + $0x48] sm:$0xff]  ;;  %v1076_v25 = vld [vmem:[#allocation13 + $0x50] sm:$0xff]  ;;  %v1077_v26 = vld [vmem:[#allocation13 + $0x58] sm:$0xff]  ;;  %s2828_s1 = sld [smem:[#allocation8 + $0x8]] }
  0xcb   : > { %1832 = vmatprep.subr.bf16.mxu1 %v1831_v5  ;;  %s2780_s26 = sld [smem:[#allocation8 + $0x4]]  ;;  %v1843_v29 = vpack.c.bf16 %v1075_v19, %v1074_v18  ;;  %v1847_v36 = vpack.c.bf16 %v1077_v26, %v1076_v25  ;;  %v1078_v38 = vld [vmem:[#allocation13 + $0x60] sm:$0xff]  ;;  %v1079_v39 = vld [vmem:[#allocation13 + $0x68] sm:$0xff]  ;;  %v1080_v58 = vld [vmem:[#allocation13 + $0x70] sm:$0xff]  ;;  %s2830_s2 = sld [smem:[#allocation7 + $0x9]] }
  0xcc   : > { %v453_v13 = vstv %s452_s18  ;;  %v469_v20 = vstv %s1533_s30  ;;  %s2785_s18 = sld [smem:[#allocation7 + $0x5]]  ;;  %s2791_s30 = sld [smem:[#allocation7 + $0x6]]  ;;  %v1851_v48 = vpack.c.bf16 %v1079_v39, %v1078_v38  ;;  %v1081_v59 = vld [vmem:[#allocation13 + $0x78] sm:$0xff] }
  0xcd   : > { %v454_v14 = vmul.f32 %v453_v13, %v2760_v9  ;;  %v455_v15 = vmul.f32 %v453_v13, %v2763_v10  ;;  %v457_v16 = vstv %s2757_s28  ;;  %v470_v22 = vmul.f32 %v469_v20, %v2760_v9  ;;  %s2789_s28 = sld [smem:[#allocation8 + $0x5]]  ;;  %s2824_s0 = sld [smem:[#allocation10 + $0x4]] }
  0xce   : > { %1834 = vmatpush3.bf16.msra.mxu1 %v1831_v5  ;;  %v471_v23 = vmul.f32 %v469_v20, %v2763_v10  ;;  %v473_v24 = vstv %s2765_s16  ;;  %v485_v28 = vstv %s2767_s10  ;;  %v501_v35 = vstv %s2774_s24  ;;  %s2796_s16 = sld [smem:[#allocation8 + $0x6]]  ;;  %s2801_s10 = sld [smem:[#allocation7 + $0x7]] }
  0xcf   : > { %1836 = vmatprep.subr.bf16.mxu1 %v1835_v8  ;;  %v458_v21 = vadd.f32 %v457_v16, %v454_v14  ;;  %v459_v27 = vadd.f32 %v457_v16, %v455_v15  ;;  %v474_v30 = vadd.f32 %v473_v24, %v470_v22  ;;  %v486_v31 = vmul.f32 %v485_v28, %v2760_v9  ;;  %s2810_s24 = sld [smem:[#allocation10]]  ;;  %s2842_s3 = sld [smem:[#allocation8 + $0x9]] }
  0xd0   : > { %v475_v32 = vadd.f32 %v473_v24, %v471_v23  ;;  %v487_v33 = vmul.f32 %v485_v28, %v2763_v10  ;;  %v489_v34 = vstv %s2769_s25  ;;  %v502_v40 = vmul.f32 %v501_v35, %v2760_v9  ;;  %s2808_s25 = sld [smem:[#allocation7 + $0x8]]  ;;  %s2853_s5 = sld [smem:[#allocation7 + $0xb]] }
  0xd1   : > { %2007 = vtanh.f32 %v458_v21  ;;  %v490_v37 = vadd.f32 %v489_v34, %v486_v31  ;;  %v503_v41 = vmul.f32 %v501_v35, %v2763_v10  ;;  %v517_v42 = vstv %s2778_s15  ;;  %s2815_s15 = sld [smem:[#allocation10 + $0x1]]  ;;  %p3460_p11 = scmp.ne.s32.totalorder %s3439_s22, 0 }
  0xd2   : > { %1838 = vmatpush3.bf16.msra.mxu1 %v1835_v8  ;;  %2009 = vtanh.f32 %v459_v27  ;;  %v491_v43 = vadd.f32 %v489_v34, %v487_v33  ;;  %v505_v44 = vstv %s2776_s23  ;;  %v518_v45 = vmul.f32 %v517_v42, %v2760_v9  ;;  %s2813_s23 = sld [smem:[#allocation8 + $0x7]] }
  0xd3   : > { %1840 = vmatprep.subr.bf16.mxu1 %v1839_v17  ;;  %2011 = vtanh.f32 %v474_v30  ;;  %v519_v46 = vmul.f32 %v517_v42, %v2763_v10  ;;  %v521_v47 = vstv %s2780_s26  ;;  %v533_v50 = vstv %s2785_s18  ;;  %s2817_s26 = sld [smem:[#allocation10 + $0x2]]  ;;  %s2822_s18 = sld [smem:[#allocation10 + $0x3]] }
  0xd4   : > { %2013 = vtanh.f32 %v475_v32  ;;  %v522_v49 = vadd.f32 %v521_v47, %v518_v45  ;;  %v506_v51 = vadd.f32 %v505_v44, %v502_v40  ;;  %v507_v52 = vadd.f32 %v505_v44, %v503_v41 }
  0xd5   : > { %2015 = vtanh.f32 %v490_v37  ;;  %v523_v53 = vadd.f32 %v521_v47, %v519_v46  ;;  %v534_v54 = vmul.f32 %v533_v50, %v2760_v9  ;;  %v535_v55 = vmul.f32 %v533_v50, %v2763_v10 }
  0xd6   : > { %1842 = vmatpush3.bf16.msra.mxu1 %v1839_v17  ;;  %2017 = vtanh.f32 %v491_v43  ;;  %v537_v56 = vstv %s2789_s28  ;;  %v549_v57 = vstv %s2791_s30  ;;  %v553_v61 = vstv %s2796_s16  ;;  %s2832_s28 = sld [smem:[#allocation10 + $0x5]]  ;;  %s2834_s30 = sld [smem:[#allocation10 + $0x6]] }
  0xd7   : > { %1844 = vmatprep.subr.bf16.mxu1 %v1843_v29  ;;  %2019 = vtanh.f32 %v522_v49  ;;  %v550_v60 = vmul.f32 %v549_v57, %v2760_v9  ;;  %v538_v62 = vadd.f32 %v537_v56, %v534_v54  ;;  %v551_v63 = vmul.f32 %v549_v57, %v2763_v10  ;;  %s2838_s16 = sld [smem:[#allocation10 + $0x7]] }
  0xd8   : > { %2021 = vtanh.f32 %v523_v53  ;;  %v565_v0 = vstv %s2801_s10  ;;  %v1855_v2 = vpack.c.bf16 %v1081_v59, %v1080_v58  ;;  %v539_v3 = vadd.f32 %v537_v56, %v535_v55  ;;  %s2844_s10 = sld [smem:[#allocation7 + $0xa]] }
  0xd9   : > { %2023 = vtanh.f32 %v506_v51  ;;  %v554_v5 = vadd.f32 %v553_v61, %v550_v60  ;;  %v566_v7 = vmul.f32 %v565_v0, %v2760_v9  ;;  %v581_v8 = vstv %s2808_s25  ;;  %s2851_s25 = sld [smem:[#allocation10 + $0x8]] }
  0xda   : > { %1846 = vmatpush3.bf16.msra.mxu1 %v1843_v29  ;;  %2025 = vtanh.f32 %v507_v52  ;;  %v462_v12 = vstv %s2810_s24  ;;  %v555_v13 = vadd.f32 %v553_v61, %v551_v63  ;;  %v569_v14 = vstv %s2813_s23  ;;  %s2860_s24 = sld [smem:[#allocation10 + $0x9]]  ;;  %s2863_s23 = sld [smem:[#allocation8 + $0xa]] }
  0xdb   : > { %1848 = vmatprep.subr.bf16.mxu1 %v1847_v36  ;;  %v2008_v1 = vpop.eup %2007  ;;  %2027 = vtanh.f32 %v538_v62  ;;  %v478_v16 = vstv %s2815_s15  ;;  %v494_v17 = vstv %s2817_s26  ;;  %v567_v18 = vmul.f32 %v565_v0, %v2763_v10  ;;  %s2883_s15 = sld [smem:[#allocation7 + $0xd]]  ;;  %s2888_s26 = sld [smem:[#allocation10 + $0xa]] }
  0xdc   : > { %v2010_v4 = vpop.eup %2009  ;;  %2029 = vtanh.f32 %v539_v3  ;;  %v510_v19 = vstv %s2822_s18  ;;  %v526_v20 = vstv %s2824_s0  ;;  %v582_v21 = vmul.f32 %v581_v8, %v2760_v9  ;;  %s2870_s0 = sld [smem:[#allocation8 + $0xb]]  ;;  %s2902_s18 = sld [smem:[#allocation7 + $0xe]] }
  0xdd   : > { %v2012_v6 = vpop.eup %2011  ;;  %2031 = vtanh.f32 %v554_v5  ;;  %v570_v23 = vadd.f32 %v569_v14, %v566_v7  ;;  %v583_v24 = vmul.f32 %v581_v8, %v2763_v10  ;;  %v585_v25 = vstv %s2828_s1  ;;  %s2872_s1 = sld [smem:[#allocation7 + $0xc]] }
  0xde   : > { %1850 = vmatpush3.bf16.msra.mxu1 %v1847_v36  ;;  %v2014_v11 = vpop.eup %2013  ;;  %v597_v26 = vstv %s2830_s2  ;;  %v463_v28 = vmul.f32 %v2008_v1, %v462_v12  ;;  %v542_v29 = vstv %s2832_s28  ;;  %2033 = vtanh.f32 %v555_v13  ;;  %s2881_s2 = sld [smem:[#allocation8 + $0xc]]  ;;  %s2915_s28 = sld [smem:[#allocation10 + $0xb]] }
  0xdf   : > { %1852 = vmatprep.subr.bf16.mxu1 %v1851_v48  ;;  %v2016_v15 = vpop.eup %2015  ;;  %v558_v30 = vstv %s2834_s30  ;;  %v464_v32 = vmul.f32 %v2010_v4, %v462_v12  ;;  %v2867_v33 = vmul.f32 %v2012_v6, %v478_v16  ;;  %v571_v34 = vadd.f32 %v569_v14, %v567_v18  ;;  %s2943_s30 = sld [smem:[#allocation7 + $0x11]] }
  0xe0   : > { %v2018_v22 = vpop.eup %2017  ;;  %v574_v35 = vstv %s2838_s16  ;;  %v2874_v37 = vmul.f32 %v2014_v11, %v478_v16  ;;  %v2876_v38 = vmul.f32 %v2016_v15, %v494_v17  ;;  %v586_v39 = vadd.f32 %v585_v25, %v582_v21  ;;  %s2969_s16 = sld [smem:[#allocation7 + $0x12]] }
  0xe1   : > { %v2020_v27 = vpop.eup %2019  ;;  %v598_v40 = vmul.f32 %v597_v26, %v2760_v9  ;;  %2035 = vtanh.f32 %v570_v23  ;;  %v587_v42 = vadd.f32 %v585_v25, %v583_v24  ;;  %v601_v43 = vstv %s2842_s3  ;;  %s2897_s3 = sld [smem:[#allocation8 + $0xd]] }
  0xe2   : > { %1854 = vmatpush3.bf16.msra.mxu1 %v1851_v48  ;;  %v2022_v31 = vpop.eup %2021  ;;  %v613_v44 = vstv %s2844_s10  ;;  %v2885_v45 = vmul.f32 %v2018_v22, %v494_v17  ;;  %v527_v46 = vmul.f32 %v2020_v27, %v526_v20  ;;  %v599_v48 = vmul.f32 %v597_v26, %v2763_v10  ;;  %s2920_s10 = sld [smem:[#allocation7 + $0xf]] }
  0xe3   : > { %1856 = vmatprep.subr.bf16.mxu1 %v1855_v2  ;;  %v2024_v36 = vpop.eup %2023  ;;  %v528_v47 = vmul.f32 %v2022_v31, %v526_v20  ;;  %2037 = vtanh.f32 %v571_v34  ;;  %v590_v50 = vstv %s2851_s25  ;;  %v629_v51 = vstv %s2853_s5  ;;  %s2912_s5 = sld [smem:[#allocation8 + $0xe]]  ;;  %s2992_s25 = sld [smem:[#allocation10 + $0xf]] }
  0xe4   : > { %v2026_v41 = vpop.eup %2025  ;;  %v2890_v49 = vmul.f32 %v2024_v36, %v510_v19  ;;  %2039 = vtanh.f32 %v586_v39  ;;  %v602_v54 = vadd.f32 %v601_v43, %v598_v40  ;;  %v614_v55 = vmul.f32 %v613_v44, %v2760_v9 }
  0xe5   : > { %v2028_v52 = vpop.eup %2027  ;;  %v2894_v53 = vmul.f32 %v2026_v41, %v510_v19  ;;  %2041 = vtanh.f32 %v587_v42  ;;  %v606_v57 = vstv %s2860_s24  ;;  %v615_v58 = vmul.f32 %v613_v44, %v2763_v10  ;;  %s3017_s24 = sld [smem:[#allocation10 + $0x11]] }
  0xe6   : > { %1858 = vmatpush3.bf16.msra.mxu1 %v1855_v2  ;;  %v2030_v56 = vpop.eup %2029  ;;  %v617_v59 = vstv %s2863_s23  ;;  %v2904_v61 = vadd.f32 %v527_v46, %v463_v28  ;;  %v2906_v62 = vadd.f32 %v528_v47, %v464_v32  ;;  %v603_v63 = vadd.f32 %v601_v43, %v599_v48  ;;  %s2925_s23 = sld [smem:[#allocation8 + $0xf]] }
  0xe7   : > { %v2032_v60 = vpop.eup %2031  ;;  %v630_v0 = vmul.f32 %v629_v51, %v2760_v9  ;;  %v543_v1 = vmul.f32 %v2028_v52, %v542_v29  ;;  %v631_v2 = vmul.f32 %v629_v51, %v2763_v10  ;;  %v633_v3 = vstv %s2870_s0  ;;  %s2933_s0 = sld [smem:[#allocation7 + $0x10]] }
  0xe8   : > { %v645_v4 = vstv %s2872_s1  ;;  %v2034_v5 = vpop.eup %2033  ;;  %v544_v6 = vmul.f32 %v2030_v56, %v542_v29  ;;  %2043 = vtanh.f32 %v602_v54  ;;  %v618_v7 = vadd.f32 %v617_v59, %v614_v55  ;;  %s2937_s1 = sld [smem:[#allocation8 + $0x10]] }
  0xe9   : > { %v646_v8 = vmul.f32 %v645_v4, %v2760_v9  ;;  %v619_v11 = vadd.f32 %v617_v59, %v615_v58  ;;  %v647_v12 = vmul.f32 %v645_v4, %v2763_v10  ;;  %v649_v13 = vstv %s2881_s2  ;;  %s2952_s2 = sld [smem:[#allocation10 + $0xc]] }
  0xea   : > { %v661_v14 = vstv %s2883_s15  ;;  %v559_v15 = vmul.f32 %v2032_v60, %v558_v30  ;;  %2045 = vtanh.f32 %v603_v63  ;;  %v622_v16 = vstv %s2888_s26  ;;  %s2960_s15 = sld [smem:[#allocation8 + $0x11]]  ;;  %s3026_s26 = sld [smem:[#allocation8 + $0x14]] }
  0xeb   : > { %v634_v17 = vadd.f32 %v633_v3, %v630_v0  ;;  %v2036_v18 = vpop.eup %2035  ;;  %v2928_v19 = vadd.f32 %v543_v1, %v2867_v33  ;;  %v560_v20 = vmul.f32 %v2034_v5, %v558_v30  ;;  %v635_v21 = vadd.f32 %v633_v3, %v631_v2 }
  0xec   : > { %v662_v22 = vmul.f32 %v661_v14, %v2760_v9  ;;  %2047 = vtanh.f32 %v618_v7  ;;  %v650_v23 = vadd.f32 %v649_v13, %v646_v8  ;;  %v663_v24 = vmul.f32 %v661_v14, %v2763_v10 }
  0xed   : > { %v665_v25 = vstv %s2897_s3  ;;  %v2038_v26 = vpop.eup %2037  ;;  %v2940_v27 = vadd.f32 %v544_v6, %v2874_v37  ;;  %2049 = vtanh.f32 %v619_v11  ;;  %v651_v28 = vadd.f32 %v649_v13, %v647_v12  ;;  %s2963_s3 = sld [smem:[#allocation10 + $0xd]] }
  0xee   : > { %v677_v29 = vstv %s2902_s18  ;;  %v2040_v30 = vpop.eup %2039  ;;  %v2946_v31 = vadd.f32 %v559_v15, %v2876_v38  ;;  %2051 = vtanh.f32 %v634_v17  ;;  %v575_v36 = vmul.f32 %v2036_v18, %v574_v35  ;;  %s2981_s18 = sld [smem:[#allocation8 + $0x12]] }
  0xef   : > { %v678_v32 = vmul.f32 %v677_v29, %v2760_v9  ;;  %v679_v33 = vmul.f32 %v677_v29, %v2763_v10  ;;  %v2042_v34 = vpop.eup %2041  ;;  %2053 = vtanh.f32 %v635_v21  ;;  %v666_v37 = vadd.f32 %v665_v25, %v662_v22 }
  0xf0   : > { %v681_v39 = vstv %s2912_s5  ;;  %v2956_v40 = vadd.f32 %v560_v20, %v2885_v45  ;;  %v576_v38 = vmul.f32 %v2038_v26, %v574_v35  ;;  %2055 = vtanh.f32 %v650_v23  ;;  %s2983_s5 = sld [smem:[#allocation10 + $0xe]] }
  0xf1   : > { %v667_v41 = vadd.f32 %v665_v25, %v663_v24  ;;  %v638_v42 = vstv %s2915_s28  ;;  %2057 = vtanh.f32 %v651_v28  ;;  %v682_v43 = vadd.f32 %v681_v39, %v678_v32  ;;  %s3048_s28 = sld [smem:[#allocation7 + $0x16]] }
  0xf2   : > { %v693_v44 = vstv %s2920_s10  ;;  %v2044_v46 = vpop.eup %2043  ;;  %v683_v47 = vadd.f32 %v681_v39, %v679_v33  ;;  %v697_v48 = vstv %s2925_s23  ;;  %v2972_v51 = vadd.f32 %v575_v36, %v2890_v49  ;;  %s2987_s10 = sld [smem:[#allocation7 + $0x13]]  ;;  %s3004_s23 = sld [smem:[#allocation10 + $0x10]] }
  0xf3   : > { %v694_v45 = vmul.f32 %v693_v44, %v2760_v9  ;;  %v695_v35 = vmul.f32 %v693_v44, %v2763_v10  ;;  %v591_v52 = vmul.f32 %v2040_v30, %v590_v50  ;;  %2059 = vtanh.f32 %v666_v37 }
  0xf4   : > { %v709_v54 = vstv %s2933_s0  ;;  %v2046_v55 = vpop.eup %2045  ;;  %v592_v56 = vmul.f32 %v2042_v34, %v590_v50  ;;  %2061 = vtanh.f32 %v667_v41  ;;  %v713_v59 = vstv %s2937_s1  ;;  %s3007_s0 = sld [smem:[#allocation7 + $0x14]]  ;;  %s3011_s1 = sld [smem:[#allocation8 + $0x13]] }
  0xf5   : > { %v710_v58 = vmul.f32 %v709_v54, %v2760_v9  ;;  %2063 = vtanh.f32 %v682_v43  ;;  %v698_v60 = vadd.f32 %v697_v48, %v694_v45  ;;  %v711_v49 = vmul.f32 %v709_v54, %v2763_v10 }
  0xf6   : > { %v725_v63 = vstv %s2943_s30  ;;  %v2048_v0 = vpop.eup %2047  ;;  %v2990_v50 = vadd.f32 %v576_v38, %v2894_v53  ;;  %2065 = vtanh.f32 %v683_v47  ;;  %v699_v1 = vadd.f32 %v697_v48, %v695_v35  ;;  %s3028_s30 = sld [smem:[#allocation7 + $0x15]] }
  0xf7   : > { %v726_v2 = vmul.f32 %v725_v63, %v2760_v9  ;;  %v2050_v3 = vpop.eup %2049  ;;  %v2996_v4 = vadd.f32 %v591_v52, %v2904_v61  ;;  %v654_v5 = vstv %s2952_s2  ;;  %v714_v6 = vadd.f32 %v713_v59, %v710_v58  ;;  %s3031_s2 = sld [smem:[#allocation10 + $0x12]] }
  0xf8   : > { %v727_v7 = vmul.f32 %v725_v63, %v2763_v10  ;;  %v2052_v8 = vpop.eup %2051  ;;  %v607_v53 = vmul.f32 %v2044_v46, %v606_v57  ;;  %v608_v11 = vmul.f32 %v2046_v55, %v606_v57  ;;  %v715_v12 = vadd.f32 %v713_v59, %v711_v49 }
  0xf9   : > { %v729_v13 = vstv %s2960_s15  ;;  %v2054_v61 = vpop.eup %2053  ;;  %v594_v14 = vadd.f32 %v592_v56, %v2906_v62  ;;  %v670_v15 = vstv %s2963_s3  ;;  %2067 = vtanh.f32 %v698_v60  ;;  %s3041_s15 = sld [smem:[#allocation10 + $0x13]]  ;;  %s3046_s3 = sld [smem:[#allocation8 + $0x15]] }
  0xfa   : > { %v730_v17 = vadd.f32 %v729_v13, %v726_v2  ;;  %v2056_v18 = vpop.eup %2055  ;;  %v623_v57 = vmul.f32 %v2048_v0, %v622_v16  ;;  %v624_v20 = vmul.f32 %v2050_v3, %v622_v16  ;;  %2069 = vtanh.f32 %v699_v1 }
  0xfb   : > { %v741_v21 = vstv %s2969_s16  ;;  %v2058_v22 = vpop.eup %2057  ;;  %v639_v62 = vmul.f32 %v2052_v8, %v638_v42  ;;  %2071 = vtanh.f32 %v714_v6  ;;  %v731_v23 = vadd.f32 %v729_v13, %v727_v7  ;;  %s3051_s16 = sld [smem:[#allocation10 + $0x14]] }
  0xfc   : > { %v742_v24 = vmul.f32 %v741_v21, %v2760_v9  ;;  %v609_v25 = vadd.f32 %v607_v53, %v2928_v19  ;;  %v610_v26 = vadd.f32 %v608_v11, %v2940_v27  ;;  %2073 = vtanh.f32 %v715_v12 }
  0xfd   : > { %v745_v16 = vstv %s2981_s18  ;;  %v2060_v28 = vpop.eup %2059  ;;  %v686_v29 = vstv %s2983_s5  ;;  %2075 = vtanh.f32 %v730_v17  ;;  %v743_v30 = vmul.f32 %v741_v21, %v2763_v10  ;;  %s3058_s18 = sld [smem:[#allocation7 + $0x17]]  ;;  %s3062_s5 = sld [smem:[#allocation8 + $0x16]] }
  0xfe   : > { %v757_v32 = vstv %s2987_s10  ;;  %v2062_v19 = vpop.eup %2061  ;;  %v625_v33 = vadd.f32 %v623_v57, %v2946_v31  ;;  %v626_v27 = vadd.f32 %v624_v20, %v2956_v40  ;;  %v640_v34 = vmul.f32 %v2054_v61, %v638_v42  ;;  %s3065_s10 = sld [smem:[#allocation7 + $0x18]] }
  0xff   : > { %v702_v36 = vstv %s2992_s25  ;;  %v2064_v37 = vpop.eup %2063  ;;  %v641_v39 = vadd.f32 %v639_v62, %v2972_v51  ;;  %v655_v38 = vmul.f32 %v2056_v18, %v654_v5  ;;  %2077 = vtanh.f32 %v731_v23  ;;  %s3070_s25 = sld [smem:[#allocation10 + $0x15]] }
 0x100   : > { %v746_v41 = vadd.f32 %v745_v16, %v742_v24  ;;  %v2066_v43 = vpop.eup %2065  ;;  %v656_v44 = vmul.f32 %v2058_v22, %v654_v5  ;;  %v718_v46 = vstv %s3004_s23  ;;  %v758_v31 = vmul.f32 %v757_v32, %v2760_v9  ;;  %s3076_s23 = sld [smem:[#allocation8 + $0x17]] }
 0x101   : > { %v773_v47 = vstv %s3007_s0  ;;  %v671_v40 = vmul.f32 %v2060_v28, %v670_v15  ;;  %v672_v42 = vmul.f32 %v2062_v19, %v670_v15  ;;  %v747_v45 = vadd.f32 %v745_v16, %v743_v30  ;;  %s3082_s0 = sld [smem:[#allocation8 + $0x18]] }
 0x102   : > { %v761_v35 = vstv %s3011_s1  ;;  %v642_v48 = vadd.f32 %v640_v34, %v2990_v50  ;;  %v687_v51 = vmul.f32 %v2064_v37, %v686_v29  ;;  %v734_v52 = vstv %s3017_s24  ;;  %s3084_s1 = sld [smem:[#allocation7 + $0x19]]  ;;  %s3088_s24 = sld [smem:[#allocation10 + $0x16]] }
 0x103   : > { %v759_v54 = vmul.f32 %v757_v32, %v2763_v10  ;;  %v2068_v55 = vpop.eup %2067  ;;  %v657_v56 = vadd.f32 %v655_v38, %v2996_v4  ;;  %v688_v58 = vmul.f32 %v2066_v43, %v686_v29  ;;  %2079 = vtanh.f32 %v746_v41 }
 0x104   : > { %v774_v59 = vmul.f32 %v773_v47, %v2760_v9  ;;  %v2070_v60 = vpop.eup %2069  ;;  %v658_v49 = vadd.f32 %v656_v44, %v594_v14  ;;  %v762_v63 = vadd.f32 %v761_v35, %v758_v31  ;;  %v777_v0 = vstv %s3026_s26  ;;  %s3092_s26 = sld [smem:[#allocation8 + $0x19]] }
 0x105   : > { %v789_v1 = vstv %s3028_s30  ;;  %v2072_v50 = vpop.eup %2071  ;;  %v673_v2 = vadd.f32 %v671_v40, %v609_v25  ;;  %v674_v3 = vadd.f32 %v672_v42, %v610_v26  ;;  %2081 = vtanh.f32 %v747_v45  ;;  %s3098_s30 = sld [smem:[#allocation7 + $0x1a]] }
 0x106   : > { %v750_v5 = vstv %s3031_s2  ;;  %v2074_v4 = vpop.eup %2073  ;;  %v3067_v6 = vadd.f32 %v687_v51, %v625_v33  ;;  %v703_v7 = vmul.f32 %v2068_v55, %v702_v36  ;;  %v763_v8 = vadd.f32 %v761_v35, %v759_v54  ;;  %s3141_s2 = sld [smem:[#allocation8 + $0x1c]] }
 0x107   : > { %v775_v53 = vmul.f32 %v773_v47, %v2763_v10  ;;  %v2076_v11 = vpop.eup %2075  ;;  %v3072_v12 = vadd.f32 %v688_v58, %v626_v27  ;;  %v766_v13 = vstv %s3041_s15  ;;  %v778_v61 = vadd.f32 %v777_v0, %v774_v59  ;;  %s3168_s15 = sld [smem:[#allocation10 + $0x19]] }
 0x108   : > { %v790_v14 = vmul.f32 %v789_v1, %v2760_v9  ;;  %v704_v15 = vmul.f32 %v2070_v60, %v702_v36  ;;  %2083 = vtanh.f32 %v762_v63  ;;  %v793_v17 = vstv %s3046_s3  ;;  %s3105_s3 = sld [smem:[#allocation8 + $0x1a]] }
 0x109   : > { %v805_v18 = vstv %s3048_s28  ;;  %v2078_v57 = vpop.eup %2077  ;;  %v719_v20 = vmul.f32 %v2072_v50, %v718_v46  ;;  %v720_v21 = vmul.f32 %v2074_v4, %v718_v46  ;;  %v782_v22 = vstv %s3051_s16  ;;  %s3111_s28 = sld [smem:[#allocation7 + $0x1b]]  ;;  %s3192_s16 = sld [smem:[#allocation8 + $0x1f]] }
 0x10a   : > { %v791_v62 = vmul.f32 %v789_v1, %v2763_v10  ;;  %v3086_v23 = vadd.f32 %v703_v7, %v641_v39  ;;  %v735_v24 = vmul.f32 %v2076_v11, %v734_v52  ;;  %2085 = vtanh.f32 %v763_v8 }
 0x10b   : > { %v779_v25 = vadd.f32 %v777_v0, %v775_v53  ;;  %2087 = vtanh.f32 %v778_v61  ;;  %v794_v26 = vadd.f32 %v793_v17, %v790_v14  ;;  %v806_v16 = vmul.f32 %v805_v18, %v2760_v9 }
 0x10c   : > { %v821_v28 = vstv %s3058_s18  ;;  %v3094_v29 = vadd.f32 %v704_v15, %v642_v48  ;;  %v736_v30 = vmul.f32 %v2078_v57, %v734_v52  ;;  %v807_v32 = vmul.f32 %v805_v18, %v2763_v10  ;;  %s3113_s18 = sld [smem:[#allocation10 + $0x17]] }
 0x10d   : > { %v809_v19 = vstv %s3062_s5  ;;  %v2080_v33 = vpop.eup %2079  ;;  %v3100_v27 = vadd.f32 %v719_v20, %v657_v56  ;;  %v3102_v34 = vadd.f32 %v720_v21, %v658_v49  ;;  %v795_v36 = vadd.f32 %v793_v17, %v791_v62  ;;  %s3125_s5 = sld [smem:[#allocation7 + $0x1c]] }
 0x10e   : > { %v837_v37 = vstv %s3065_s10  ;;  %v3107_v39 = vadd.f32 %v735_v24, %v673_v2  ;;  %2089 = vtanh.f32 %v779_v25  ;;  %v798_v38 = vstv %s3070_s25  ;;  %s3131_s10 = sld [smem:[#allocation8 + $0x1b]]  ;;  %s3211_s25 = sld [smem:[#allocation10 + $0x1d]] }
 0x10f   : > { %v822_v41 = vmul.f32 %v821_v28, %v2760_v9  ;;  %v2082_v43 = vpop.eup %2081  ;;  %2091 = vtanh.f32 %v794_v26  ;;  %v810_v44 = vadd.f32 %v809_v19, %v806_v16  ;;  %v823_v46 = vmul.f32 %v821_v28, %v2763_v10 }
 0x110   : > { %v825_v31 = vstv %s3076_s23  ;;  %v3117_v47 = vadd.f32 %v736_v30, %v674_v3  ;;  %v751_v40 = vmul.f32 %v2080_v33, %v750_v5  ;;  %v811_v42 = vadd.f32 %v809_v19, %v807_v32  ;;  %s3133_s23 = sld [smem:[#allocation10 + $0x18]] }
 0x111   : > { %v838_v45 = vmul.f32 %v837_v37, %v2760_v9  ;;  %2093 = vtanh.f32 %v795_v36  ;;  %v839_v35 = vmul.f32 %v837_v37, %v2763_v10  ;;  %v841_v48 = vstv %s3082_s0  ;;  %s3149_s0 = sld [smem:[#allocation7 + $0x1d]] }
 0x112   : > { %v853_v51 = vstv %s3084_s1  ;;  %v2084_v52 = vpop.eup %2083  ;;  %v752_v54 = vmul.f32 %v2082_v43, %v750_v5  ;;  %v814_v55 = vstv %s3088_s24  ;;  %v826_v56 = vadd.f32 %v825_v31, %v822_v41  ;;  %s3151_s1 = sld [smem:[#allocation8 + $0x1d]]  ;;  %s969_s24 = sld [smem:[#allocation2]] }
 0x113   : > { %v854_v58 = vmul.f32 %v853_v51, %v2760_v9  ;;  %2095 = vtanh.f32 %v810_v44  ;;  %v827_v59 = vadd.f32 %v825_v31, %v823_v46  ;;  %v855_v60 = vmul.f32 %v853_v51, %v2763_v10 }
 0x114   : > { %v857_v49 = vstv %s3092_s26  ;;  %v2086_v63 = vpop.eup %2085  ;;  %v3138_v0 = vadd.f32 %v751_v40, %v3067_v6  ;;  %2097 = vtanh.f32 %v811_v42  ;;  %v842_v1 = vadd.f32 %v841_v48, %v838_v45  ;;  %s3161_s26 = sld [smem:[#allocation7 + $0x1e]] }
 0x115   : > { %v869_v50 = vstv %s3098_s30  ;;  %v2088_v2 = vpop.eup %2087  ;;  %v843_v3 = vadd.f32 %v841_v48, %v839_v35  ;;  %v873_v7 = vstv %s3105_s3  ;;  %v767_v8 = vmul.f32 %v2084_v52, %v766_v13  ;;  %s3172_s30 = sld [smem:[#allocation8 + $0x1e]]  ;;  %s3177_s3 = sld [smem:[#allocation7 + $0x1f]] }
 0x116   : > { %v870_v5 = vmul.f32 %v869_v50, %v2760_v9  ;;  %v871_v4 = vmul.f32 %v869_v50, %v2763_v10  ;;  %2099 = vtanh.f32 %v826_v56  ;;  %v858_v6 = vadd.f32 %v857_v49, %v854_v58 }
 0x117   : > { %v885_v53 = vstv %s3111_s28  ;;  %v3154_v11 = vadd.f32 %v752_v54, %v3072_v12  ;;  %2101 = vtanh.f32 %v827_v59  ;;  %v830_v61 = vstv %s3113_s18  ;;  %s3188_s28 = sld [smem:[#allocation10 + $0x1a]]  ;;  %v2147_v59 = vld [vmem:[%s2735_s27 + $0x8] sm:$0xff]  ;;  %s3294_s18 = scalar_lea.vmem [#allocation16], %s2731_s19 }
 0x118   : > { %v859_v14 = vadd.f32 %v857_v49, %v855_v60  ;;  %v2090_v15 = vpop.eup %2089  ;;  %v768_v17 = vmul.f32 %v2086_v63, %v766_v13  ;;  %v783_v18 = vmul.f32 %v2088_v2, %v782_v22  ;;  %2103 = vtanh.f32 %v842_v1 }
 0x119   : > { %v874_v57 = vadd.f32 %v873_v7, %v870_v5  ;;  %v2092_v20 = vpop.eup %2091  ;;  %2105 = vtanh.f32 %v843_v3  ;;  %v875_v21 = vadd.f32 %v873_v7, %v871_v4  ;;  %v886_v12 = vmul.f32 %v885_v53, %v2760_v9  ;;  %v2148_v4 = vld [vmem:[%s2735_s27] sm:$0xff]  ;;  %s3236_s27 = sld [smem:[#allocation10 + $0x1f]] }
 0x11a   : > { %v901_v62 = vstv %s3125_s5  ;;  %v3166_v24 = vadd.f32 %v767_v8, %v3086_v23  ;;  %2107 = vtanh.f32 %v858_v6  ;;  %v887_v13 = vmul.f32 %v885_v53, %v2763_v10  ;;  %s3196_s5 = sld [smem:[#allocation10 + $0x1c]] }
 0x11b   : > { %v889_v25 = vstv %s3131_s10  ;;  %v2094_v26 = vpop.eup %2093  ;;  %v846_v16 = vstv %s3133_s23  ;;  %2109 = vtanh.f32 %v859_v14  ;;  %v902_v28 = vmul.f32 %v901_v62, %v2760_v9  ;;  %s3203_s10 = sld [smem:[#allocation10 + $0x1b]]  ;;  %s1329_s23 = sshll.u32 %s3294_s18, 4  ;;  %s3317_s23 = int_to_ptr.vmem [resolvable:$true] %s1329_s23 }
 0x11c   : > { %v903_v30 = vmul.f32 %v901_v62, %v2763_v10  ;;  %v3180_v23 = vadd.f32 %v768_v17, %v3094_v29  ;;  %v784_v32 = vmul.f32 %v2090_v15, %v782_v22  ;;  %2111 = vtanh.f32 %v874_v57 }
 0x11d   : > { %v905_v19 = vstv %s3141_s2  ;;  %v2096_v33 = vpop.eup %2095  ;;  %v3186_v36 = vadd.f32 %v783_v18, %v3100_v27  ;;  %2113 = vtanh.f32 %v875_v21  ;;  %v890_v37 = vadd.f32 %v889_v25, %v886_v12  ;;  %s3219_s2 = sld [smem:[#allocation10 + $0x1e]] }
 0x11e   : > { %v906_v41 = vadd.f32 %v905_v19, %v902_v28  ;;  %v2098_v43 = vpop.eup %2097  ;;  %v891_v44 = vadd.f32 %v889_v25, %v887_v13  ;;  %v907_v29 = vadd.f32 %v905_v19, %v903_v30  ;;  %v917_v46 = vstv %s3149_s0  ;;  %s1634_s0 = sshll.u32 %s2514_s17, 8 }
 0x11f   : > { %v921_v31 = vstv %s3151_s1  ;;  %v799_v22 = vmul.f32 %v2092_v20, %v798_v38  ;;  %v918_v27 = vmul.f32 %v917_v46, %v2760_v9  ;;  %v919_v40 = vmul.f32 %v917_v46, %v2763_v10 }
 0x120   : > { %2115 = vtanh.f32 %v906_v41  ;;  %v2100_v42 = vpop.eup %2099  ;;  %v786_v45 = vadd.f32 %v784_v32, %v3102_v34  ;;  %v800_v35 = vmul.f32 %v2094_v26, %v798_v38  ;;  %v933_v48 = vstv %s3161_s26 }
 0x121   : > { %2117 = vtanh.f32 %v907_v29  ;;  %v2102_v51 = vpop.eup %2101  ;;  %v922_v52 = vadd.f32 %v921_v31, %v918_v27  ;;  %v923_v54 = vadd.f32 %v921_v31, %v919_v40  ;;  %v934_v56 = vmul.f32 %v933_v48, %v2760_v9 }
 0x122   : > { %2119 = vtanh.f32 %v890_v37  ;;  %v2104_v10 = vpop.eup %2103  ;;  %v862_v58 = vstv %s3168_s15  ;;  %v935_v34 = vmul.f32 %v2147_v59, %v933_v48  ;;  %v937_v60 = vstv %s3172_s30  ;;  %s3325_s15 = scalar_lea.hbm %s3417_s8, %s1634_s0  ;;  %s1311_s30 = scalar_lea.sflag [#allocation5], %s2728_s21 }
 0x123   : > { %2121 = vtanh.f32 %v891_v44  ;;  %v2106_v38 = vpop.eup %2105  ;;  %v801_v49 = vadd.f32 %v799_v22, %v3107_v39  ;;  %v938_v63 = vadd.f32 %v937_v60, %v934_v56  ;;  %v949_v1 = vstv %s3177_s3  ;;  %s2308_s3 = scalar_lea.vmem %s3317_s23, 256 }
 0x124   : > { %2123 = vtanh.f32 %v922_v52  ;;  %v2108_v50 = vpop.eup %2107  ;;  %v815_v9 = vmul.f32 %v2096_v33, %v814_v55  ;;  %v816_v2 = vmul.f32 %v2098_v43, %v814_v55  ;;  %v939_v3 = vadd.f32 %v937_v60, %v935_v34  ;;  %p2309_p10 = scmp.ne.s32.totalorder %s3317_s23, %s2308_s3 }
 0x125   : > { %2125 = vtanh.f32 %v923_v54  ;;  %v2110_v5 = vpop.eup %2109  ;;  %v802_v39 = vadd.f32 %v800_v35, %v3117_v47  ;;  %v950_v7 = vmul.f32 %v2148_v4, %v949_v1  ;;  %v951_v8 = vmul.f32 %v2147_v59, %v949_v1 }
 0x126   : > { %2127 = vtanh.f32 %v938_v63  ;;  %v2112_v6 = vpop.eup %2111  ;;  %v847_v53 = vmul.f32 %v2104_v10, %v846_v16  ;;  %v878_v55 = vstv %s3188_s28  ;;  %v953_v14 = vstv %s3192_s16  ;;  %p2310_p3 = pnand %p2309_p10, %p3460_p11  ;;  %s2433_s28 = smov [#allocation16]  }
 0x127   : > { %2129 = vtanh.f32 %v939_v3  ;;  %v2114_v15 = vpop.eup %2113  ;;  %v848_v17 = vmul.f32 %v2106_v38, %v846_v16  ;;  %v910_v18 = vstv %s3196_s5  ;;  %v954_v47 = vadd.f32 %v953_v14, %v950_v7  ;;  %s2312_s16 = sshll.u32 %s2433_s28, 4  ;;  %s2313_s16 = int_to_ptr.vmem [resolvable:$false] %s2312_s16 }
 0x128   : > { %v955_v57 = vadd.f32 %v953_v14, %v951_v8  ;;  %v817_v20 = vadd.f32 %v815_v9, %v3138_v0  ;;  %v818_v21 = vadd.f32 %v816_v2, %v3154_v11  ;;  %v863_v12 = vmul.f32 %v2108_v50, %v862_v58  ;;  %p2311_p12 = pneg %p2310_p3  ;;  %s2314_s5 = scalar_lea.vmem %s2313_s16, 512 }
 0x129   : > { %v894_v62 = vstv %s3203_s10  ;;  %v831_v25 = vmul.f32 %v2100_v42, %v830_v61  ;;  %v832_v26 = vmul.f32 %v2102_v51, %v830_v61  ;;  %v864_v28 = vmul.f32 %v2110_v5, %v862_v58  ;;  %p2315_p13 = scmp.lt.s32.totalorder %s3317_s23, %s2313_s16  ;;  %p2316_p8 = scmp.lt.s32.totalorder %s2314_s5, %s2308_s3 }
 0x12a   : > { %v2116_v13 = vpop.eup %2115  ;;  %2131 = vtanh.f32 %v954_v47  ;;  %v849_v30 = vadd.f32 %v847_v53, %v3186_v36  ;;  %v879_v32 = vmul.f32 %v2112_v6, %v878_v55  ;;  %v850_v19 = vadd.f32 %v848_v17, %v786_v45  ;;  %v976_v47 = vld [vmem:[#allocation11 + $0x8] sm:$0xff] }
 0x12b   : > { %v2118_v16 = vpop.eup %2117  ;;  %v911_v0 = vmul.f32 %v2116_v13, %v910_v18  ;;  %2133 = vtanh.f32 %v955_v57  ;;  %v880_v33 = vmul.f32 %v2114_v15, %v878_v55  ;;  %v926_v41 = vstv %s3211_s25  ;;  %v977_v57 = vld [vmem:[#allocation11 + $0x10] sm:$0xff]  ;;  %v980_v13 = vld [vmem:[#allocation11 + $0x28] sm:$0xff]  ;;  %p2317_p4 = por %p2316_p8, %p2315_p13 }
 0x12c   : > { %v2120_v11 = vpop.eup %2119  ;;  %v912_v37 = vmul.f32 %v2118_v16, %v910_v18  ;;  %v865_v44 = vadd.f32 %v863_v12, %v801_v49  ;;  %v833_v61 = vadd.f32 %v831_v25, %v3166_v24  ;;  %v834_v46 = vadd.f32 %v832_v26, %v3180_v23  ;;  %v975_v18 = vld [vmem:[#allocation11] sm:$0xff]  ;;  %v981_v26 = vld [vmem:[#allocation11 + $0x30] sm:$0xff] }
 0x12d   : > { %v2122_v43 = vpop.eup %2121  ;;  %v866_v31 = vadd.f32 %v864_v28, %v802_v39  ;;  %v942_v22 = vstv %s3219_s2  ;;  %v881_v36 = vadd.f32 %v879_v32, %v817_v20  ;;  %v895_v40 = vmul.f32 %v2120_v11, %v894_v62  ;;  %v982_v28 = vld [vmem:[#allocation11 + $0x38] sm:$0xff]  ;;  %v984_v32 = vld [vmem:[#allocation11 + $0x48] sm:$0xff]  ;;  %v985_v11 = vld [vmem:[#allocation11 + $0x50] sm:$0xff]  ;;  %p2318_p7 = pnand %p2317_p4, %p2311_p12 }
 0x12e   : > { %v2124_v29 = vpop.eup %2123  ;;  %v913_v42 = vadd.f32 %v911_v0, %v849_v30  ;;  %v882_v45 = vadd.f32 %v880_v33, %v818_v21  ;;  %v896_v51 = vmul.f32 %v2122_v43, %v894_v62  ;;  %v914_v52 = vadd.f32 %v912_v37, %v850_v19  ;;  %v978_v21 = vld [vmem:[#allocation11 + $0x18] sm:$0xff]  ;;  %v979_v62 = vld [vmem:[#allocation11 + $0x20] sm:$0xff] }
 0x12f   : > { %v2126_v27 = vpop.eup %2125  ;;  %v927_v35 = vmul.f32 %v2124_v29, %v926_v41  ;;  %v958_v23 = vstv %s3236_s27  ;;  %v897_v34 = vadd.f32 %v895_v40, %v833_v61  ;;  %v970_v8 = vstv %s969_s24  ;;  %v983_v30 = vld [vmem:[#allocation11 + $0x40] sm:$0xff]  ;;  %v986_v19 = vld [vmem:[#allocation11 + $0x58] sm:$0xff] }
 0x130   : > { %v2128_v48 = vpop.eup %2127  ;;  %v928_v54 = vmul.f32 %v2126_v27, %v926_v41  ;;  %v898_v63 = vadd.f32 %v896_v51, %v834_v46  ;;  %v1795_v20 = vpack.c.bf16 %v976_v47, %v975_v18  ;;  %v1799_v12 = vpack.c.bf16 %v978_v21, %v977_v57  ;;  %v987_v37 = vld [vmem:[#allocation11 + $0x60] sm:$0xff]  ;;  %v988_v41 = vld [vmem:[#allocation11 + $0x68] sm:$0xff]  ;;  %v990_v29 = vld [vmem:[#allocation11 + $0x78] sm:$0xff] }
 0x131   : > { %v2130_v56 = vpop.eup %2129  ;;  %v929_v10 = vadd.f32 %v927_v35, %v865_v44  ;;  %v943_v58 = vmul.f32 %v2128_v48, %v942_v22  ;;  %v1803_v25 = vpack.c.bf16 %v980_v13, %v979_v62  ;;  %v1807_v16 = vpack.c.bf16 %v982_v28, %v981_v26  ;;  %v989_v44 = vld [vmem:[#allocation11 + $0x70] sm:$0xff]  ;;  %v1211_v46 = vld [vmem:[#allocation14] sm:$0xff] }
 0x132   : > { %v930_v24 = vadd.f32 %v928_v54, %v866_v31  ;;  %v944_v59 = vmul.f32 %v2130_v56, %v942_v22  ;;  %1796 = vmatprep.subr.bf16.mxu0 %v1795_v20  ;;  %v1811_v0 = vpack.c.bf16 %v984_v32, %v983_v30  ;;  %v1815_v33 = vpack.c.bf16 %v986_v19, %v985_v11  ;;  %v1212_v31 = vld [vmem:[#allocation14 + $0x8] sm:$0xff] }
 0x133   : > { %v945_v60 = vadd.f32 %v943_v58, %v881_v36  ;;  %v963_v38 = vadd.f32 %v929_v10, %v913_v42  ;;  %1798 = vmatpush3.bf16.msra.mxu0 %v1795_v20  ;;  %v1819_v43 = vpack.c.bf16 %v988_v41, %v987_v37  ;;  %v1823_v61 = vpack.c.bf16 %v990_v29, %v989_v44 }
 0x134   : > { %v2132_v49 = vpop.eup %2131  ;;  %v946_v1 = vadd.f32 %v944_v59, %v882_v45  ;;  %v964_v50 = vadd.f32 %v930_v24, %v914_v52  ;;  %1800 = vmatprep.subr.bf16.mxu0 %v1799_v12  ;;  %v1859_v22 = vpack.c.bf16 %v1212_v31, %v1211_v46  ;;  %v1159_v27 = vlaneseq }
 0x135   : > { %v2134_v9 = vpop.eup %2133  ;;  %v959_v2 = vmul.f32 %v2132_v49, %v958_v23  ;;  %v965_v3 = vadd.f32 %v963_v38, %v945_v60  ;;  %v1215_v38 = vld [vmem:[#allocation14 + $0x20] sm:$0xff]  ;;  %v1216_v49 = vld [vmem:[#allocation14 + $0x28] sm:$0xff] }
 0x136   : > { %v960_v5 = vmul.f32 %v2134_v9, %v958_v23  ;;  %v966_v39 = vadd.f32 %v964_v50, %v946_v1  ;;  %v3244_v36 = vand.u32 127, %v1159_v27  ;;  %v1213_v23 = vld [vmem:[#allocation14 + $0x10] sm:$0xff]  ;;  %v1218_v50 = vld [vmem:[#allocation14 + $0x38] sm:$0xff] }
 0x137   : > { %v961_v4 = vadd.f32 %v959_v2, %v897_v34  ;;  %1802 = vmatpush3.bf16.msra.mxu0 %v1799_v12  ;;  %v1214_v34 = vld [vmem:[#allocation14 + $0x18] sm:$0xff]  ;;  %v1217_v1 = vld [vmem:[#allocation14 + $0x30] sm:$0xff]  ;;  %v1219_v2 = vld [vmem:[#allocation14 + $0x40] sm:$0xff] }
 0x138   : > { %v962_v7 = vadd.f32 %v960_v5, %v898_v63  ;;  %1804 = vmatprep.subr.bf16.mxu0 %v1803_v25  ;;  %vm1172_vm0 = vcmp.ge.s32.totalorder %v3244_v36, 50  ;;  %vm1173_vm1 = vcmp.lt.s32.totalorder %v3244_v36, 100  ;;  %vm1162_vm3 = vcmp.lt.s32.totalorder %v3244_v36, 50 }
 0x139   : > { %v967_v6 = vadd.f32 %v965_v3, %v961_v4  ;;  %vm3248_vm2 = vmand %vm1172_vm0, %vm1173_vm1  ;;  %vm1183_vm4 = vcmp.ge.s32.totalorder %v3244_v36, 100  ;;  %vm1184_vm5 = vcmp.lt.s32.totalorder %v3244_v36, 104  ;;  %vm1194_vm7 = vcmp.ge.s32.totalorder %v3244_v36, 104  ;;  %v1220_v3 = vld [vmem:[#allocation14 + $0x48] sm:$0xff]  ;;  %v1222_v4 = vld [vmem:[#allocation14 + $0x58] sm:$0xff] }
 0x13a   : > { %v968_v53 = vadd.f32 %v966_v39, %v962_v7  ;;  %vm3265_vm6 = vmand %vm1183_vm4, %vm1184_vm5  ;;  %vm1195_vm8 = vcmp.lt.s32.totalorder %v3244_v36, 108  ;;  %v1863_v60 = vpack.c.bf16 %v1214_v34, %v1213_v23  ;;  %v1867_v63 = vpack.c.bf16 %v1216_v49, %v1215_v38  ;;  %v1221_v39 = vld [vmem:[#allocation14 + $0x50] sm:$0xff] }
 0x13b   : > { %v971_v55 = vadd.f32 %v970_v8, %v967_v6  ;;  %1806 = vmatpush3.bf16.msra.mxu0 %v1803_v25  ;;  %vm3283_vm9 = vmand %vm1194_vm7, %vm1195_vm8  ;;  %v1871_v9 = vpack.c.bf16 %v1218_v50, %v1217_v1  ;;  %v1875_v5 = vpack.c.bf16 %v1220_v3, %v1219_v2  ;;  %v1879_v7 = vpack.c.bf16 %v1222_v4, %v1221_v39  ;;  %v1224_v6 = vld [vmem:[#allocation14 + $0x68] sm:$0xff] }
 0x13c   : > { %v972_v14 = vadd.f32 %v970_v8, %v968_v53  ;;  %1808 = vmatprep.subr.bf16.mxu0 %v1807_v16  ;;  %v1223_v8 = vld [vmem:[#allocation14 + $0x60] sm:$0xff]  ;;  %v1225_v53 = vld [vmem:[#allocation14 + $0x70] sm:$0xff] }
 0x13d   : > { %2135 = vtanh.f32 %v971_v55  ;;  %v1883_v55 = vpack.c.bf16 %v1224_v6, %v1223_v8 }
 0x13e   : > { %2137 = vtanh.f32 %v972_v14  ;;  %v1226_v14 = vld [vmem:[#allocation14 + $0x78] sm:$0xff] }
 0x13f   : > { %1810 = vmatpush3.bf16.msra.mxu0 %v1807_v16 }
 0x140   : > { %1812 = vmatprep.subr.bf16.mxu0 %v1811_v0 }
 0x143   : > { %1814 = vmatpush3.bf16.msra.mxu0 %v1811_v0 }
 0x144   : > { %1816 = vmatprep.subr.bf16.mxu0 %v1815_v33 }
 0x147   : > { %v2136_v15 = vpop.eup %2135  ;;  %1818 = vmatpush3.bf16.msra.mxu0 %v1815_v33 }
 0x148   : > { %v2138_v17 = vpop.eup %2137  ;;  %1757 = vmatprep.mubr.f32.mxu1 %v2136_v15  ;;  %1722 = vmatprep.mubr.f32.mxu0 %v2136_v15  ;;  %v1887_v15 = vpack.c.bf16 %v1226_v14, %v1225_v53 }
 0x149   : > { %1758 = vmatmul.mubr.f32.vlgmr.msra.gmra.mrb[0].mxu1 %v2138_v17  ;;  %1820 = vmatprep.subr.bf16.mxu0 %v1819_v43 }
 0x14b   : > { %1822 = vmatpush3.bf16.msra.mxu0 %v1819_v43 }
 0x14c   : > { %1824 = vmatprep.subr.bf16.mxu0 %v1823_v61 }
 0x14f   : > { %1826 = vmatpush3.bf16.msra.mxu0 %v1823_v61 }
 0x150   : > { %1860 = vmatprep.subr.bf16.mxu0 %v1859_v22 }
 0x152   : > { %1723 = vmatmul.mubr.f32.vlgmr.msra.gmra.mrb[0].mxu0 %v2138_v17 }
 0x153   : > { %1862 = vmatpush3.bf16.msra.mxu0 %v1859_v22 }
 0x154   : > { %1864 = vmatprep.subr.bf16.mxu0 %v1863_v60 }
 0x157   : > { %1866 = vmatpush3.bf16.msra.mxu0 %v1863_v60 }
 0x158   : > { %1868 = vmatprep.subr.bf16.mxu0 %v1867_v63 }
 0x15b   : > { %1870 = vmatpush3.bf16.msra.mxu0 %v1867_v63 }
 0x15c   : > { %1872 = vmatprep.subr.bf16.mxu0 %v1871_v9 }
 0x15f   : > { %1874 = vmatpush3.bf16.msra.mxu0 %v1871_v9 }
 0x160   : > { %1876 = vmatprep.subr.bf16.mxu0 %v1875_v5 }
 0x163   : > { %1878 = vmatpush3.bf16.msra.mxu0 %v1875_v5 }
 0x164   : > { %1880 = vmatprep.subr.bf16.mxu0 %v1879_v7 }
 0x167   : > { %1882 = vmatpush3.bf16.msra.mxu0 %v1879_v7 }
 0x168   : > { %1884 = vmatprep.subr.bf16.mxu0 %v1883_v55 }
 0x16b   : > { %1886 = vmatpush3.bf16.msra.mxu0 %v1883_v55 }
 0x16c   : > { %1888 = vmatprep.subr.bf16.mxu0 %v1887_v15 }
 0x16f   : > { %1890 = vmatpush3.bf16.msra.mxu0 %v1887_v15 }
 0x21c   : > { %v3255_v42 = vpop.f32.mrb[0].mxu1 }
 0x21d   : > { %v3257_v35 = vpop.f32.mrb[1].mxu1  ;;  %v1176_v48 = vsel %vm3248_vm2, %v3255_v42, -inf  ;;  %v1165_v45 = vsel %vm1162_vm3, %v3255_v42, -inf  ;;  %v1187_v52 = vsel %vm3265_vm6, %v3255_v42, -inf  ;;  %v1198_v24 = vsel %vm3283_vm9, %v3255_v42, -inf }
 0x21e   : > { %1179 = vmax.xlane.f32.xlu1 %v1176_v48  ;;  %1168 = vmax.xlane.f32.xlu0 %v1165_v45  ;;  %v1164_v54 = vsel %vm1162_vm3, %v3257_v35, -inf  ;;  %v1175_v56 = vsel %vm3248_vm2, %v3257_v35, -inf  ;;  %v1186_v10 = vsel %vm3265_vm6, %v3257_v35, -inf  ;;  %v1197_v59 = vsel %vm3283_vm9, %v3257_v35, -inf }
 0x222   : > { %1190 = vmax.xlane.f32.xlu1 %v1187_v52  ;;  %1166 = vmax.xlane.f32.xlu0 %v1164_v54 }
 0x225   : > { %v1724_v17 = vpop.f32.mrb[0].mxu0 }
 0x226   : > { %1177 = vmax.xlane.f32.xlu1 %v1175_v56  ;;  %1188 = vmax.xlane.f32.xlu0 %v1186_v10  ;;  %1158 = vst [vmem:[%s3294_s18 + $0x8] sm:$0xff] %v1724_v17  ;;  %v1057_v18 = vpop.f32.mrb[1].mxu0 }
 0x227   : > { %1157 = vst [vmem:[%s3294_s18] sm:$0xff] %v1057_v18 }
 0x22a   : > { %1201 = vmax.xlane.f32.xlu1 %v1198_v24  ;;  %1199 = vmax.xlane.f32.xlu0 %v1197_v59 }
 0x2ab   : > { %v1180_v47 = vpop.xlane.xlu1 %1179  ;;  %v1169_v57 = vpop.xlane.xlu0 %1168 }
 0x2ac   : > { %v1171_v12 = vsel %vm1162_vm3, %v1169_v57, 0.0 }
 0x2ad   : > { %v1182_v28 = vsel %vm3248_vm2, %v1180_v47, %v1171_v12 }
 0x2af   : > { %v1191_v20 = vpop.xlane.xlu1 %1190  ;;  %v1167_v21 = vpop.xlane.xlu0 %1166 }
 0x2b0   : > { %v1170_v62 = vsel %vm1162_vm3, %v1167_v21, 0.0  ;;  %v1193_v16 = vsel %vm3265_vm6, %v1191_v20, %v1182_v28 }
 0x2b3   : > { %v1178_v13 = vpop.xlane.xlu1 %1177  ;;  %v1189_v25 = vpop.xlane.xlu0 %1188 }
 0x2b4   : > { %v1181_v26 = vsel %vm3248_vm2, %v1178_v13, %v1170_v62 }
 0x2b5   : > { %v1192_v30 = vsel %vm3265_vm6, %v1189_v25, %v1181_v26 }
 0x2b7   : > { %v1202_v32 = vpop.xlane.xlu1 %1201  ;;  %v1200_v0 = vpop.xlane.xlu0 %1199 }
 0x2b8   : > { %v1204_v11 = vsel %vm3283_vm9, %v1202_v32, %v1193_v16  ;;  %v1203_v19 = vsel %vm3283_vm9, %v1200_v0, %v1192_v30 }
 0x2b9   : > { %v1206_v33 = vsub.f32 %v3255_v42, %v1204_v11  ;;  %v1205_v37 = vsub.f32 %v3257_v35, %v1203_v19 }
 0x2bb   : > { %v1209_v41 = vmul.f32 1.442695, %v1206_v33  ;;  %v1207_v43 = vmul.f32 1.442695, %v1205_v37 }
 0x2bd   : > { %2139 = vpow2.f32 %v1209_v41 }
 0x2be   : > { %2141 = vpow2.f32 %v1207_v43 }
 0x2c7   : > { %v2140_v44 = vpop.eup %2139 }
 0x2c8   : > { %v2142_v29 = vpop.eup %2141 }
 0x2c9   : > { %1792 = vmatprep.mubr.f32.mxu0 %v2142_v29 }
 0x2ca   : > { %1793 = vmatmul.mubr.f32.vlgmr.msra.gmra.mrb[2].mxu0 %v2140_v44 }
 0x2cb   : > { %2321 = shalt.err (!%p2318_p7)
}
 0x2cc   : > { %s2322_s10 = scalar_lea.hbm %s3325_s15, 256  ;;  %s2326_s27 = scalar_lea.hbm %s3417_s8, 512 }
 0x2cd   : > { %p2323_p9 = scmp.ne.s32.totalorder %s3325_s15, %s2322_s10  ;;  %p2327_p2 = scmp.lt.u32.totalorder %s3325_s15, %s3417_s8 }
 0x2ce   : > { %p2328_p6 = scmp.lt.u32.totalorder %s2326_s27, %s2322_s10  ;;  %p2330_p10 = scmp.lt.u32.totalorder %s2322_s10, %s3325_s15 }
 0x2cf   : > { %p2324_p1 = pnand %p2323_p9, %p3460_p11 }
 0x2d0   : > { %p2329_p5 = por %p2328_p6, %p2327_p2 }
 0x2d1   : > { %p2325_p0 = pneg %p2324_p1 }
 0x2d2   : > { %p2331_p3 = por %p2330_p10, %p2329_p5 }
 0x2d4   : > { %p2332_p12 = pnand %p2331_p3, %p2325_p0 }
 0x2d6   : > { %2335 = shalt.err (!%p2332_p12)
}
 0x2d7   : > { %s2434_s1 = smov 128   ;;  %s2435_s26 = smov 8  }
 0x2d8   : > { %1917 = dma.vmem_to_hbm [thread:$0]  (%p3460_p11), %s3317_s23, 256, %s3325_s15, %s1311_s30, %s2434_s1, %s2434_s1, %s2435_s26  }
 0x2d9   : > { %s445_s3 = scalar_lea.vmem [#allocation17], %s2731_s19  ;;  %s3360_s10 = scalar_lea.hbm %s3418_s9, %s1634_s0 }
 0x2da   : > { %s1345_s28 = sshll.u32 %s445_s3, 4  ;;  %s1316_s23 = scalar_lea.sflag [#allocation18], %s2728_s21  ;;  %s3362_s28 = int_to_ptr.vmem [resolvable:$true] %s1345_s28 }
 0x2db   : > { %s2336_s15 = scalar_lea.vmem %s3362_s28, 256  ;;  %s2436_s19 = smov [#allocation17]  }
 0x2dc   : > { %p2337_p13 = scmp.ne.s32.totalorder %s3362_s28, %s2336_s15  ;;  %s2340_s17 = sshll.u32 %s2436_s19, 4  ;;  %s2341_s17 = int_to_ptr.vmem [resolvable:$false] %s2340_s17 }
 0x2dd   : > { %s2342_s30 = scalar_lea.vmem %s2341_s17, 512  ;;  %p2343_p7 = scmp.lt.s32.totalorder %s3362_s28, %s2341_s17 }
 0x2de   : > { %p2338_p8 = pnand %p2337_p13, %p3460_p11  ;;  %p2344_p9 = scmp.lt.s32.totalorder %s2342_s30, %s2336_s15 }
 0x2e0   : > { %p2339_p4 = pneg %p2338_p8  ;;  %p2345_p1 = por %p2344_p9, %p2343_p7 }
 0x2e2   : > { %p2346_p0 = pnand %p2345_p1, %p2339_p4 }
 0x39d   : > { %v1794_v61 = vpop.f32.mrb[2].mxu0 }
 0x39e   : > { %2143 = vlog2.f32 %v1794_v61  ;;  %v1293_v46 = vpop.f32.mrb[3].mxu0 }
 0x39f   : > { %2145 = vlog2.f32 %v1293_v46 }
 0x3a8   : > { %v2144_v31 = vpop.eup %2143 }
 0x3a9   : > { %v2146_v22 = vpop.eup %2145  ;;  %v1305_v27 = vmul.f32 0.6931472, %v2144_v31 }
 0x3aa   : > { %v1303_v36 = vmul.f32 0.6931472, %v2146_v22 }
 0x3ab   : > { %v1307_v40 = vsub.f32 %v1206_v33, %v1305_v27 }
 0x3ac   : > { %v1306_v42 = vsub.f32 %v1205_v37, %v1303_v36 }
 0x3ad   : > { %1309 = vst [vmem:[%s445_s3 + $0x8] sm:$0xff] %v1307_v40 }
 0x3ae   : > { %1308 = vst [vmem:[%s445_s3] sm:$0xff] %v1306_v42 }
 0x3af   : > { %2349 = shalt.err (!%p2346_p0)
}
 0x3b0   : > { %s2350_s0 = scalar_lea.hbm %s3360_s10, 256  ;;  %s2354_s27 = scalar_lea.hbm %s3418_s9, 512 }
 0x3b1   : > { %p2351_p2 = scmp.ne.s32.totalorder %s3360_s10, %s2350_s0  ;;  %p2355_p10 = scmp.lt.u32.totalorder %s3360_s10, %s3418_s9 }
 0x3b2   : > { %p2356_p3 = scmp.lt.u32.totalorder %s2354_s27, %s2350_s0  ;;  %p2358_p13 = scmp.lt.u32.totalorder %s2350_s0, %s3360_s10 }
 0x3b3   : > { %p2352_p6 = pnand %p2351_p2, %p3460_p11 }
 0x3b4   : > { %p2357_p12 = por %p2356_p3, %p2355_p10 }
 0x3b5   : > { %p2353_p5 = pneg %p2352_p6 }
 0x3b6   : > { %p2359_p8 = por %p2358_p13, %p2357_p12 }
 0x3b8   : > { %p2360_p4 = pnand %p2359_p8, %p2353_p5 }
 0x3ba   : > { %2363 = shalt.err (!%p2360_p4)
}
 0x3bb   : > { %1918 = dma.vmem_to_hbm [thread:$0]  (%p3460_p11), %s3362_s28, 256, %s3360_s10, %s1316_s23, %s2434_s1, %s2434_s1, %s2435_s26  }
 0x3bc PF: > { %s1360_s3 = sand.u32 1, %s2410_s11   ;;  %p3461_p7 = scmp.ne.s32.totalorder %s3440_s20, 0 }
 0x3bd   : > { %p3462_p9 = scmp.ge.s32.totalorder %s2422_s14, 2  ;;  %s1361_s16 = scalar_lea.sflag [#allocation5], %s1360_s3 }
 0x3bf   : > { %p1945_p1 = pnand %p3462_p9, %p3461_p7 }
 0x3c1   : > { %2401 = dma.done.wait (!%p1945_p1), %s1361_s16, 256  }
 0x3c2   : > { %2403 = vsyncadd (!%p1945_p1), %s1361_s16, 4294967040  ;;  %s1370_s22 = scalar_lea.sflag [#allocation18], %s1360_s3 }
 0x3c3   : > { %2405 = dma.done.wait (!%p1945_p1), %s1370_s22, 256  }
 0x3c4   : > { %2407 = vsyncadd (!%p1945_p1), %s1370_s22, 4294967040  ;;  %p31_p11 = scmp.ge.s32.totalorder %s2646_s29, 4   ;;  %s3463_s11 = smov %s2414_s12 }
 0x3c5   : > { %s3464_s12 = smov %s2418_s13  ;;  %s3465_s13 = smov %s2657_s4 }
 0x3c6   : > { %s3466_s14 = smov %s2646_s29  ;;  %33 = sbr.rel (!%p31_p11) target bundleno = 18 (0x12), region = 139 }
 0x3cd   :  { %1375 = vsyncpa [#allocation4], 1 }
 0x3ce   :  { %1377 = vsyncpa [#allocation4 + $0x1], 1 }
 0x3cf   :  { %1378 = vsyncpa [#allocation12], 1 }
 0x3d0   :  { %1379 = vsyncpa [#allocation15], 1 }
 0x3d1   :  { %1380 = vsyncpa [#allocation5], 1 }
 0x3d2   :  { %1382 = vsyncpa [#allocation5 + $0x1], 1 }
 0x3d3   :  { %1383 = vsyncpa [#allocation18], 1 }
 0x3d4   :  { %1385 = vsyncpa [#allocation18 + $0x1], 1 }
 0x3d5   :  { %1386 = vsyncpa [#allocation6], 1 }
 0x3d6   :  { %1388 = vsyncpa [#allocation6 + $0x1], 1 }
 0x3d7   :  { %1389 = vsyncpa [#allocation9], 1 }

</bundles_post_ra>
